<compile_context>
chip_gen: v6e
topology: v6e:2x2x1
jax: 0.10.0
libtpu: 0.0.40
codegen_flags: <defaults>
</compile_context>

<pallas_src>
import numpy as np
import jax
import jax.numpy as jnp
from jax import lax
from jax.experimental import pallas as pl
from jax.experimental.pallas import tpu as pltpu


def _round_up(a, m):
    return ((a + m - 1) // m) * m


def _upsample_matrix(n_in, n_out):
    """Row-interpolation matrix for bilinear upsample with align_corners=True."""
    U = np.zeros((n_out, n_in), dtype=np.float32)
    if n_out == 1 or n_in == 1:
        U[:, 0] = 1.0
        return U
    for o in range(n_out):
        src = o * (n_in - 1) / (n_out - 1)
        lo = int(np.floor(src))
        hi = min(lo + 1, n_in - 1)
        f = src - lo
        U[o, lo] += 1.0 - f
        U[o, hi] += f
    return U


def _make_ao_kernel(NB, Cin_p, Cmid_p, Cout_p, Cout, H, W, OH, OW, mm_dtype):
    HW = H * W
    NBHW = NB * HW
    OHW = OH * OW
    TAPS = tuple((dy, dx) for dy in (-1, 0, 1) for dx in (-1, 0, 1))

    def kernel(x_ref, w1_ref, b1_ref, w2_ref, b2_ref, ukt_ref, out_ref):
        # (h, w) of every flattened column (same pattern for each image in the block),
        # generated on the VPU instead of shipping a (9, NB*HW) mask array from HBM.
        # f32 floor-division keeps the index math on always-supported VPU ops.
        cols = lax.broadcasted_iota(jnp.int32, (1, NBHW), 1).astype(jnp.float32)
        hw = cols - jnp.floor(cols / HW) * HW          # position within the image
        row = jnp.floor(hw / W)                        # h
        col = hw - row * W                             # w

        # Per-tap zero-pad masks (shared by both convs): zero wherever the 3x3 tap falls in
        # the pad=1 border; this also zeroes every roll-wrap across row/image boundaries.
        masks = {}
        for (dy, dx) in TAPS:
            if (dy, dx) == (0, 0):
                continue
            ok = ((row >= float(-dy)) & (row <= float(H - 1 - dy)) &
                  (col >= float(-dx)) & (col <= float(W - 1 - dx)))
            masks[(dy, dx)] = ok.astype(jnp.float32)   # (1, NBHW), broadcast over channels

        def patches(a):
            """im2col (C, NBHW) -> (9*C, NBHW) via lane rolls + in-register boundary masks."""
            parts = []
            for (dy, dx) in TAPS:
                s = dy * W + dx
                if s == 0:
                    parts.append(a)                                    # center tap
                else:
                    sh = pltpu.roll(a, (-s) % NBHW, axis=1)            # sh[:, j] = a[:, j+s]
                    parts.append(sh * masks[(dy, dx)])                 # zero padded/wrapped taps
            # every part has C % 8 == 0 sublanes -> aligned, cheap concat
            return jnp.concatenate(parts, axis=0)

        def mm(a, b):
            # Optional reduced-precision MXU path (v6e/v7x); accumulation stays f32.
            if mm_dtype != jnp.float32:
                a = a.astype(mm_dtype)
                b = b.astype(mm_dtype)
            return jnp.dot(a, b, preferred_element_type=jnp.float32)

        # conv1 (3x3, pad=1) with folded BatchNorm, then ReLU          -> (Cmid_p, NBHW)
        a1 = mm(w1_ref[...], patches(x_ref[...]))
        a1 = jnp.maximum(a1 + b1_ref[...], 0.0)

        # conv2 (3x3, pad=1)                                           -> (Cout_p, NBHW)
        z = mm(w2_ref[...], patches(a1)) + b2_ref[...]

        # Bilinear x2 upsample (align_corners=True): ONE lane-dense matmul per image against
        # the precomputed (HW, OHW) Kron matrix; output written directly as flattened NCHW.
        for n in range(NB):
            z_n = z[:, n * HW:(n + 1) * HW]                            # (Cout_p, HW) lane slice
            up = jnp.dot(z_n, ukt_ref[...], preferred_element_type=jnp.float32)
            out_ref[n] = up[:Cout, :]                                  # (Cout, OHW)

    return kernel


def init_ao_params(key, inchannels, outchannels):
    Cmid = inchannels // 2
    k1, k2, k3, k4 = jax.random.split(key, 4)
    # deterministic synthetic init (HWIO weight layout)
    w1 = jax.random.normal(k1, (3, 3, inchannels, Cmid), jnp.float32) * 0.1
    b1 = jax.random.normal(k2, (Cmid,), jnp.float32) * 0.1
    w2 = jax.random.normal(k3, (3, 3, Cmid, outchannels), jnp.float32) * 0.1
    b2 = jax.random.normal(k4, (outchannels,), jnp.float32) * 0.1
    # BatchNorm2d defaults: gamma=1, beta=0, running_mean=0, running_var=1, eps=1e-5
    # TODO(synk): BatchNorm implemented in eval mode (running stats folded into conv1);
    #             training-mode batch statistics are not computed.
    eps = 1e-5
    gamma = jnp.ones((Cmid,), jnp.float32)
    beta = jnp.zeros((Cmid,), jnp.float32)
    rmean = jnp.zeros((Cmid,), jnp.float32)
    rvar = jnp.ones((Cmid,), jnp.float32)
    bn_scale = gamma / jnp.sqrt(rvar + eps)
    bn_shift = beta - rmean * bn_scale
    return dict(w1=w1, b1=b1, bn_scale=bn_scale, bn_shift=bn_shift, w2=w2, b2=b2)


def ao_forward(x_nchw, p, upfactor=2, batch_block=None, matmul_dtype=jnp.float32):
    N, Cin, H, W = x_nchw.shape
    Cmid = p["w1"].shape[-1]
    Cout = p["w2"].shape[-1]
    OH, OW = upfactor * H, upfactor * W
    HW, OHW = H * W, OH * OW

    SUB = 8  # f32 sublane tile
    Cin_p = _round_up(Cin, SUB)
    Cmid_p = _round_up(Cmid, SUB)
    Cout_p = _round_up(Cout, SUB)

    # Batch tiling: >=2 grid steps by default so the "parallel" axis can be split across
    # v7x's two TensorCores and input/output DMA overlaps across steps.
    NB = batch_block if batch_block is not None else max(1, N // 2)
    assert N % NB == 0, "batch_block must divide N"

    # channels-first activations: (C, N*HW) with batch*spatial flattened onto lanes
    # column index = n*HW + h*W + w
    x_cf = jnp.transpose(x_nchw.astype(jnp.float32).reshape(N, Cin, HW), (1, 0, 2))
    x_cf = x_cf.reshape(Cin, N * HW)
    if Cin_p != Cin:
        x_cf = jnp.pad(x_cf, ((0, Cin_p - Cin), (0, 0)))

    # conv1 weights with BatchNorm folded (eval mode), im2col layout (Cmid_p, 9*Cin_p)
    w1 = jnp.pad(p["w1"], ((0, 0), (0, 0), (0, Cin_p - Cin), (0, Cmid_p - Cmid)))
    w1m = jnp.transpose(w1, (3, 0, 1, 2)).reshape(Cmid_p, 9 * Cin_p)
    bn_scale = jnp.pad(p["bn_scale"], (0, Cmid_p - Cmid))
    bn_shift = jnp.pad(p["bn_shift"], (0, Cmid_p - Cmid))
    b1 = jnp.pad(p["b1"], (0, Cmid_p - Cmid))
    w1m = w1m * bn_scale[:, None]
    b1f = (b1 * bn_scale + bn_shift).reshape(Cmid_p, 1)   # padded rows stay exactly 0 -> ReLU(0)=0

    # conv2 weights, im2col layout (Cout_p, 9*Cmid_p)
    w2 = jnp.pad(p["w2"], ((0, 0), (0, 0), (0, Cmid_p - Cmid), (0, Cout_p - Cout)))
    w2m = jnp.transpose(w2, (3, 0, 1, 2)).reshape(Cout_p, 9 * Cmid_p)
    b2f = jnp.pad(p["b2"], (0, Cout_p - Cout)).reshape(Cout_p, 1)

    # Bilinear align_corners=True upsample as a single (HW, OHW) matrix (Kron of the two
    # separable 1-D interpolation matrices).  ~4*HW*OHW bytes: 1 MiB at 16x16 -> 32x32.
    # TODO(synk): for large spatial dims (Kron >~ a few MiB) switch to the separable
    #             (Uh, Uw) form with a batched dot_general instead of the Kron matrix.
    Uk = np.kron(_upsample_matrix(H, OH), _upsample_matrix(W, OW))   # (OHW, HW)
    UkT = jnp.asarray(Uk.T)                                          # (HW, OHW)

    kernel = _make_ao_kernel(NB, Cin_p, Cmid_p, Cout_p, Cout, H, W, OH, OW, matmul_dtype)

    out_flat = pl.pallas_call(
        kernel,
        out_shape=jax.ShapeDtypeStruct((N, Cout, OHW), jnp.float32),
        grid=(N // NB,),
        in_specs=[
            pl.BlockSpec((Cin_p, NB * HW), lambda i: (0, i)),
            pl.BlockSpec((Cmid_p, 9 * Cin_p), lambda i: (0, 0)),
            pl.BlockSpec((Cmid_p, 1), lambda i: (0, 0)),
            pl.BlockSpec((Cout_p, 9 * Cmid_p), lambda i: (0, 0)),
            pl.BlockSpec((Cout_p, 1), lambda i: (0, 0)),
            pl.BlockSpec((HW, OHW), lambda i: (0, 0)),
        ],
        out_specs=pl.BlockSpec((NB, Cout, OHW), lambda i: (i, 0, 0)),
        compiler_params=pltpu.CompilerParams(dimension_semantics=("parallel",)),
    )(x_cf, w1m, b1f, w2m, b2f, UkT)

    # (N, Cout, OH*OW) is already NCHW flattened -> free reshape, no transpose needed
    return out_flat.reshape(N, Cout, OH, OW)


def ao_reference(x_nchw, p, upfactor=2):
    """Pure-JAX reference (same math: XLA conv + explicit interpolation matrices)."""
    N, Cin, H, W = x_nchw.shape
    x = jnp.transpose(x_nchw, (0, 2, 3, 1)).astype(jnp.float32)
    dn = ("NHWC", "HWIO", "NHWC")
    y = lax.conv_general_dilated(x, p["w1"], (1, 1), "SAME", dimension_numbers=dn)
    y = y + p["b1"]
    y = y * p["bn_scale"] + p["bn_shift"]
    y = jnp.maximum(y, 0.0)
    z = lax.conv_general_dilated(y, p["w2"], (1, 1), "SAME", dimension_numbers=dn)
    z = z + p["b2"]
    Uh = jnp.asarray(_upsample_matrix(H, upfactor * H))
    Uw = jnp.asarray(_upsample_matrix(W, upfactor * W))
    z = jnp.einsum("Hh,nhwc->nHwc", Uh, z)
    z = jnp.einsum("Ww,nhwc->nhWc", Uw, z)
    return jnp.transpose(z, (0, 3, 1, 2))


if __name__ == "__main__":
    key = jax.random.PRNGKey(0)
    kx, kp = jax.random.split(key)

    N, Cin, H, W = 2, 8, 16, 16
    Cout, upfactor = 2, 2

    x = jax.random.normal(kx, (N, Cin, H, W), jnp.float32)
    params = init_ao_params(kp, Cin, Cout)

    out = ao_forward(x, params, upfactor=upfactor)   # default batch_block=N//2 -> grid=(2,)
    out = jax.block_until_ready(out)

    assert out.shape == (N, Cout, upfactor * H, upfactor * W), out.shape

    ref = ao_reference(x, params, upfactor=upfactor)
    np.testing.assert_allclose(np.asarray(out), np.asarray(ref), rtol=1e-4, atol=1e-4)

    print("KERNEL_OK")
</pallas_src>

<mosaic_0001>
module attributes {stable_mosaic.version = 11 : i64} {
  func.func @kernel(%arg0: i32, %arg1: memref<8x256xf32, #tpu.memory_space<vmem>>, %arg2: memref<8x72xf32, #tpu.memory_space<vmem>>, %arg3: memref<8x1xf32, #tpu.memory_space<vmem>>, %arg4: memref<8x72xf32, #tpu.memory_space<vmem>>, %arg5: memref<8x1xf32, #tpu.memory_space<vmem>>, %arg6: memref<256x1024xf32, #tpu.memory_space<vmem>>, %arg7: memref<1x2x1024xf32, #tpu.memory_space<vmem>>) attributes {dimension_semantics = [#tpu.dimension_semantics<parallel>], iteration_bounds = array<i64: 2>, scalar_prefetch = 0 : i64, scratch_operands = 0 : i64, tpu.core_type = #tpu.core_type<tc>, window_params = [{transform_indices = @transform_0, window_bounds = array<i64: 8, 256>}, {pipeline_mode = #tpu.pipeline_mode<synchronous>, transform_indices = @transform_1, window_bounds = array<i64: 8, 72>}, {pipeline_mode = #tpu.pipeline_mode<synchronous>, transform_indices = @transform_2, window_bounds = array<i64: 8, 1>}, {pipeline_mode = #tpu.pipeline_mode<synchronous>, transform_indices = @transform_3, window_bounds = array<i64: 8, 72>}, {pipeline_mode = #tpu.pipeline_mode<synchronous>, transform_indices = @transform_4, window_bounds = array<i64: 8, 1>}, {pipeline_mode = #tpu.pipeline_mode<synchronous>, transform_indices = @transform_5, window_bounds = array<i64: 256, 1024>}, {transform_indices = @transform_6, window_bounds = array<i64: 1, 2, 1024>}]} {
    %0 = tpu.iota {dimensions = array<i32: 1>} : vector<1x256xi32>
    %1 = arith.sitofp %0 : vector<1x256xi32> to vector<1x256xf32>
    %cst = arith.constant 2.560000e+02 : f32
    %2 = vector.broadcast %cst : f32 to vector<1x256xf32>
    %3 = arith.divf %1, %2 : vector<1x256xf32>
    %4 = math.floor %3 : vector<1x256xf32>
    %cst_0 = arith.constant 2.560000e+02 : f32
    %5 = vector.broadcast %cst_0 : f32 to vector<1x256xf32>
    %6 = arith.mulf %4, %5 : vector<1x256xf32>
    %7 = arith.subf %1, %6 : vector<1x256xf32>
    %cst_1 = arith.constant 1.600000e+01 : f32
    %8 = vector.broadcast %cst_1 : f32 to vector<1x256xf32>
    %9 = arith.divf %7, %8 : vector<1x256xf32>
    %10 = math.floor %9 : vector<1x256xf32>
    %cst_2 = arith.constant 1.600000e+01 : f32
    %11 = vector.broadcast %cst_2 : f32 to vector<1x256xf32>
    %12 = arith.mulf %10, %11 : vector<1x256xf32>
    %13 = arith.subf %7, %12 : vector<1x256xf32>
    %cst_3 = arith.constant 1.000000e+00 : f32
    %14 = vector.broadcast %cst_3 : f32 to vector<1x256xf32>
    %15 = arith.cmpf oge, %10, %14 : vector<1x256xf32>
    %cst_4 = arith.constant 1.600000e+01 : f32
    %16 = vector.broadcast %cst_4 : f32 to vector<1x256xf32>
    %17 = arith.cmpf ole, %10, %16 : vector<1x256xf32>
    %18 = arith.andi %15, %17 : vector<1x256xi1>
    %cst_5 = arith.constant 1.000000e+00 : f32
    %19 = vector.broadcast %cst_5 : f32 to vector<1x256xf32>
    %20 = arith.cmpf oge, %13, %19 : vector<1x256xf32>
    %21 = arith.andi %18, %20 : vector<1x256xi1>
    %cst_6 = arith.constant 1.600000e+01 : f32
    %22 = vector.broadcast %cst_6 : f32 to vector<1x256xf32>
    %23 = arith.cmpf ole, %13, %22 : vector<1x256xf32>
    %24 = arith.andi %21, %23 : vector<1x256xi1>
    %25 = arith.extui %24 : vector<1x256xi1> to vector<1x256xi32>
    %26 = arith.sitofp %25 : vector<1x256xi32> to vector<1x256xf32>
    %cst_7 = arith.constant 1.000000e+00 : f32
    %27 = vector.broadcast %cst_7 : f32 to vector<1x256xf32>
    %28 = arith.cmpf oge, %10, %27 : vector<1x256xf32>
    %cst_8 = arith.constant 1.600000e+01 : f32
    %29 = vector.broadcast %cst_8 : f32 to vector<1x256xf32>
    %30 = arith.cmpf ole, %10, %29 : vector<1x256xf32>
    %31 = arith.andi %28, %30 : vector<1x256xi1>
    %cst_9 = arith.constant 0.000000e+00 : f32
    %32 = vector.broadcast %cst_9 : f32 to vector<1x256xf32>
    %33 = arith.cmpf oge, %13, %32 : vector<1x256xf32>
    %34 = arith.andi %31, %33 : vector<1x256xi1>
    %cst_10 = arith.constant 1.500000e+01 : f32
    %35 = vector.broadcast %cst_10 : f32 to vector<1x256xf32>
    %36 = arith.cmpf ole, %13, %35 : vector<1x256xf32>
    %37 = arith.andi %34, %36 : vector<1x256xi1>
    %38 = arith.extui %37 : vector<1x256xi1> to vector<1x256xi32>
    %39 = arith.sitofp %38 : vector<1x256xi32> to vector<1x256xf32>
    %cst_11 = arith.constant 1.000000e+00 : f32
    %40 = vector.broadcast %cst_11 : f32 to vector<1x256xf32>
    %41 = arith.cmpf oge, %10, %40 : vector<1x256xf32>
    %cst_12 = arith.constant 1.600000e+01 : f32
    %42 = vector.broadcast %cst_12 : f32 to vector<1x256xf32>
    %43 = arith.cmpf ole, %10, %42 : vector<1x256xf32>
    %44 = arith.andi %41, %43 : vector<1x256xi1>
    %cst_13 = arith.constant -1.000000e+00 : f32
    %45 = vector.broadcast %cst_13 : f32 to vector<1x256xf32>
    %46 = arith.cmpf oge, %13, %45 : vector<1x256xf32>
    %47 = arith.andi %44, %46 : vector<1x256xi1>
    %cst_14 = arith.constant 1.400000e+01 : f32
    %48 = vector.broadcast %cst_14 : f32 to vector<1x256xf32>
    %49 = arith.cmpf ole, %13, %48 : vector<1x256xf32>
    %50 = arith.andi %47, %49 : vector<1x256xi1>
    %51 = arith.extui %50 : vector<1x256xi1> to vector<1x256xi32>
    %52 = arith.sitofp %51 : vector<1x256xi32> to vector<1x256xf32>
    %cst_15 = arith.constant 0.000000e+00 : f32
    %53 = vector.broadcast %cst_15 : f32 to vector<1x256xf32>
    %54 = arith.cmpf oge, %10, %53 : vector<1x256xf32>
    %cst_16 = arith.constant 1.500000e+01 : f32
    %55 = vector.broadcast %cst_16 : f32 to vector<1x256xf32>
    %56 = arith.cmpf ole, %10, %55 : vector<1x256xf32>
    %57 = arith.andi %54, %56 : vector<1x256xi1>
    %cst_17 = arith.constant 1.000000e+00 : f32
    %58 = vector.broadcast %cst_17 : f32 to vector<1x256xf32>
    %59 = arith.cmpf oge, %13, %58 : vector<1x256xf32>
    %60 = arith.andi %57, %59 : vector<1x256xi1>
    %cst_18 = arith.constant 1.600000e+01 : f32
    %61 = vector.broadcast %cst_18 : f32 to vector<1x256xf32>
    %62 = arith.cmpf ole, %13, %61 : vector<1x256xf32>
    %63 = arith.andi %60, %62 : vector<1x256xi1>
    %64 = arith.extui %63 : vector<1x256xi1> to vector<1x256xi32>
    %65 = arith.sitofp %64 : vector<1x256xi32> to vector<1x256xf32>
    %cst_19 = arith.constant 0.000000e+00 : f32
    %66 = vector.broadcast %cst_19 : f32 to vector<1x256xf32>
    %67 = arith.cmpf oge, %10, %66 : vector<1x256xf32>
    %cst_20 = arith.constant 1.500000e+01 : f32
    %68 = vector.broadcast %cst_20 : f32 to vector<1x256xf32>
    %69 = arith.cmpf ole, %10, %68 : vector<1x256xf32>
    %70 = arith.andi %67, %69 : vector<1x256xi1>
    %cst_21 = arith.constant -1.000000e+00 : f32
    %71 = vector.broadcast %cst_21 : f32 to vector<1x256xf32>
    %72 = arith.cmpf oge, %13, %71 : vector<1x256xf32>
    %73 = arith.andi %70, %72 : vector<1x256xi1>
    %cst_22 = arith.constant 1.400000e+01 : f32
    %74 = vector.broadcast %cst_22 : f32 to vector<1x256xf32>
    %75 = arith.cmpf ole, %13, %74 : vector<1x256xf32>
    %76 = arith.andi %73, %75 : vector<1x256xi1>
    %77 = arith.extui %76 : vector<1x256xi1> to vector<1x256xi32>
    %78 = arith.sitofp %77 : vector<1x256xi32> to vector<1x256xf32>
    %cst_23 = arith.constant -1.000000e+00 : f32
    %79 = vector.broadcast %cst_23 : f32 to vector<1x256xf32>
    %80 = arith.cmpf oge, %10, %79 : vector<1x256xf32>
    %cst_24 = arith.constant 1.400000e+01 : f32
    %81 = vector.broadcast %cst_24 : f32 to vector<1x256xf32>
    %82 = arith.cmpf ole, %10, %81 : vector<1x256xf32>
    %83 = arith.andi %80, %82 : vector<1x256xi1>
    %cst_25 = arith.constant 1.000000e+00 : f32
    %84 = vector.broadcast %cst_25 : f32 to vector<1x256xf32>
    %85 = arith.cmpf oge, %13, %84 : vector<1x256xf32>
    %86 = arith.andi %83, %85 : vector<1x256xi1>
    %cst_26 = arith.constant 1.600000e+01 : f32
    %87 = vector.broadcast %cst_26 : f32 to vector<1x256xf32>
    %88 = arith.cmpf ole, %13, %87 : vector<1x256xf32>
    %89 = arith.andi %86, %88 : vector<1x256xi1>
    %90 = arith.extui %89 : vector<1x256xi1> to vector<1x256xi32>
    %91 = arith.sitofp %90 : vector<1x256xi32> to vector<1x256xf32>
    %cst_27 = arith.constant -1.000000e+00 : f32
    %92 = vector.broadcast %cst_27 : f32 to vector<1x256xf32>
    %93 = arith.cmpf oge, %10, %92 : vector<1x256xf32>
    %cst_28 = arith.constant 1.400000e+01 : f32
    %94 = vector.broadcast %cst_28 : f32 to vector<1x256xf32>
    %95 = arith.cmpf ole, %10, %94 : vector<1x256xf32>
    %96 = arith.andi %93, %95 : vector<1x256xi1>
    %cst_29 = arith.constant 0.000000e+00 : f32
    %97 = vector.broadcast %cst_29 : f32 to vector<1x256xf32>
    %98 = arith.cmpf oge, %13, %97 : vector<1x256xf32>
    %99 = arith.andi %96, %98 : vector<1x256xi1>
    %cst_30 = arith.constant 1.500000e+01 : f32
    %100 = vector.broadcast %cst_30 : f32 to vector<1x256xf32>
    %101 = arith.cmpf ole, %13, %100 : vector<1x256xf32>
    %102 = arith.andi %99, %101 : vector<1x256xi1>
    %103 = arith.extui %102 : vector<1x256xi1> to vector<1x256xi32>
    %104 = arith.sitofp %103 : vector<1x256xi32> to vector<1x256xf32>
    %cst_31 = arith.constant -1.000000e+00 : f32
    %105 = vector.broadcast %cst_31 : f32 to vector<1x256xf32>
    %106 = arith.cmpf oge, %10, %105 : vector<1x256xf32>
    %cst_32 = arith.constant 1.400000e+01 : f32
    %107 = vector.broadcast %cst_32 : f32 to vector<1x256xf32>
    %108 = arith.cmpf ole, %10, %107 : vector<1x256xf32>
    %109 = arith.andi %106, %108 : vector<1x256xi1>
    %cst_33 = arith.constant -1.000000e+00 : f32
    %110 = vector.broadcast %cst_33 : f32 to vector<1x256xf32>
    %111 = arith.cmpf oge, %13, %110 : vector<1x256xf32>
    %112 = arith.andi %109, %111 : vector<1x256xi1>
    %cst_34 = arith.constant 1.400000e+01 : f32
    %113 = vector.broadcast %cst_34 : f32 to vector<1x256xf32>
    %114 = arith.cmpf ole, %13, %113 : vector<1x256xf32>
    %115 = arith.andi %112, %114 : vector<1x256xi1>
    %116 = arith.extui %115 : vector<1x256xi1> to vector<1x256xi32>
    %117 = arith.sitofp %116 : vector<1x256xi32> to vector<1x256xf32>
    %c0 = arith.constant 0 : index
    %c0_35 = arith.constant 0 : index
    %118 = vector.load %arg2[%c0, %c0_35] : memref<8x72xf32, #tpu.memory_space<vmem>>, vector<8x72xf32>
    %c0_36 = arith.constant 0 : index
    %c0_37 = arith.constant 0 : index
    %119 = vector.load %arg1[%c0_36, %c0_37] : memref<8x256xf32, #tpu.memory_space<vmem>>, vector<8x256xf32>
    %c17_i32 = arith.constant 17 : i32
    %120 = tpu.dynamic_rotate %119 by %c17_i32 dim 1 : vector<8x256xf32>, i32 -> vector<8x256xf32>
    %121 = vector.broadcast %26 : vector<1x256xf32> to vector<8x256xf32>
    %122 = arith.mulf %120, %121 : vector<8x256xf32>
    %c16_i32 = arith.constant 16 : i32
    %123 = tpu.dynamic_rotate %119 by %c16_i32 dim 1 : vector<8x256xf32>, i32 -> vector<8x256xf32>
    %124 = vector.broadcast %39 : vector<1x256xf32> to vector<8x256xf32>
    %125 = arith.mulf %123, %124 : vector<8x256xf32>
    %c15_i32 = arith.constant 15 : i32
    %126 = tpu.dynamic_rotate %119 by %c15_i32 dim 1 : vector<8x256xf32>, i32 -> vector<8x256xf32>
    %127 = vector.broadcast %52 : vector<1x256xf32> to vector<8x256xf32>
    %128 = arith.mulf %126, %127 : vector<8x256xf32>
    %c1_i32 = arith.constant 1 : i32
    %129 = tpu.dynamic_rotate %119 by %c1_i32 dim 1 : vector<8x256xf32>, i32 -> vector<8x256xf32>
    %130 = vector.broadcast %65 : vector<1x256xf32> to vector<8x256xf32>
    %131 = arith.mulf %129, %130 : vector<8x256xf32>
    %c255_i32 = arith.constant 255 : i32
    %132 = tpu.dynamic_rotate %119 by %c255_i32 dim 1 : vector<8x256xf32>, i32 -> vector<8x256xf32>
    %133 = vector.broadcast %78 : vector<1x256xf32> to vector<8x256xf32>
    %134 = arith.mulf %132, %133 : vector<8x256xf32>
    %c241_i32 = arith.constant 241 : i32
    %135 = tpu.dynamic_rotate %119 by %c241_i32 dim 1 : vector<8x256xf32>, i32 -> vector<8x256xf32>
    %136 = vector.broadcast %91 : vector<1x256xf32> to vector<8x256xf32>
    %137 = arith.mulf %135, %136 : vector<8x256xf32>
    %c240_i32 = arith.constant 240 : i32
    %138 = tpu.dynamic_rotate %119 by %c240_i32 dim 1 : vector<8x256xf32>, i32 -> vector<8x256xf32>
    %139 = vector.broadcast %104 : vector<1x256xf32> to vector<8x256xf32>
    %140 = arith.mulf %138, %139 : vector<8x256xf32>
    %c239_i32 = arith.constant 239 : i32
    %141 = tpu.dynamic_rotate %119 by %c239_i32 dim 1 : vector<8x256xf32>, i32 -> vector<8x256xf32>
    %142 = vector.broadcast %117 : vector<1x256xf32> to vector<8x256xf32>
    %143 = arith.mulf %141, %142 : vector<8x256xf32>
    %144 = tpu.concatenate %122, %125, %128, %131, %119, %134, %137, %140, %143 in 0 : vector<8x256xf32>, vector<8x256xf32>, vector<8x256xf32>, vector<8x256xf32>, vector<8x256xf32>, vector<8x256xf32>, vector<8x256xf32>, vector<8x256xf32>, vector<8x256xf32> -> vector<72x256xf32>
    %cst_38 = arith.constant dense<0.000000e+00> : vector<8x256xf32>
    %145 = tpu.matmul %118, %144, %cst_38 {dimension_numbers = #tpu.dot_dimension_numbers<[1], [0], [0], [1], [0, 0, 1, 1], [], []>} : vector<8x72xf32>, vector<72x256xf32>, vector<8x256xf32> -> vector<8x256xf32>
    %c0_39 = arith.constant 0 : index
    %c0_40 = arith.constant 0 : index
    %146 = vector.load %arg3[%c0_39, %c0_40] : memref<8x1xf32, #tpu.memory_space<vmem>>, vector<8x1xf32>
    %147 = vector.broadcast %146 : vector<8x1xf32> to vector<8x256xf32>
    %148 = arith.addf %145, %147 : vector<8x256xf32>
    %cst_41 = arith.constant 0.000000e+00 : f32
    %149 = vector.broadcast %cst_41 : f32 to vector<8x256xf32>
    %150 = arith.maximumf %148, %149 : vector<8x256xf32>
    %c0_42 = arith.constant 0 : index
    %c0_43 = arith.constant 0 : index
    %151 = vector.load %arg4[%c0_42, %c0_43] : memref<8x72xf32, #tpu.memory_space<vmem>>, vector<8x72xf32>
    %c17_i32_44 = arith.constant 17 : i32
    %152 = tpu.dynamic_rotate %150 by %c17_i32_44 dim 1 : vector<8x256xf32>, i32 -> vector<8x256xf32>
    %153 = vector.broadcast %26 : vector<1x256xf32> to vector<8x256xf32>
    %154 = arith.mulf %152, %153 : vector<8x256xf32>
    %c16_i32_45 = arith.constant 16 : i32
    %155 = tpu.dynamic_rotate %150 by %c16_i32_45 dim 1 : vector<8x256xf32>, i32 -> vector<8x256xf32>
    %156 = vector.broadcast %39 : vector<1x256xf32> to vector<8x256xf32>
    %157 = arith.mulf %155, %156 : vector<8x256xf32>
    %c15_i32_46 = arith.constant 15 : i32
    %158 = tpu.dynamic_rotate %150 by %c15_i32_46 dim 1 : vector<8x256xf32>, i32 -> vector<8x256xf32>
    %159 = vector.broadcast %52 : vector<1x256xf32> to vector<8x256xf32>
    %160 = arith.mulf %158, %159 : vector<8x256xf32>
    %c1_i32_47 = arith.constant 1 : i32
    %161 = tpu.dynamic_rotate %150 by %c1_i32_47 dim 1 : vector<8x256xf32>, i32 -> vector<8x256xf32>
    %162 = vector.broadcast %65 : vector<1x256xf32> to vector<8x256xf32>
    %163 = arith.mulf %161, %162 : vector<8x256xf32>
    %c255_i32_48 = arith.constant 255 : i32
    %164 = tpu.dynamic_rotate %150 by %c255_i32_48 dim 1 : vector<8x256xf32>, i32 -> vector<8x256xf32>
    %165 = vector.broadcast %78 : vector<1x256xf32> to vector<8x256xf32>
    %166 = arith.mulf %164, %165 : vector<8x256xf32>
    %c241_i32_49 = arith.constant 241 : i32
    %167 = tpu.dynamic_rotate %150 by %c241_i32_49 dim 1 : vector<8x256xf32>, i32 -> vector<8x256xf32>
    %168 = vector.broadcast %91 : vector<1x256xf32> to vector<8x256xf32>
    %169 = arith.mulf %167, %168 : vector<8x256xf32>
    %c240_i32_50 = arith.constant 240 : i32
    %170 = tpu.dynamic_rotate %150 by %c240_i32_50 dim 1 : vector<8x256xf32>, i32 -> vector<8x256xf32>
    %171 = vector.broadcast %104 : vector<1x256xf32> to vector<8x256xf32>
    %172 = arith.mulf %170, %171 : vector<8x256xf32>
    %c239_i32_51 = arith.constant 239 : i32
    %173 = tpu.dynamic_rotate %150 by %c239_i32_51 dim 1 : vector<8x256xf32>, i32 -> vector<8x256xf32>
    %174 = vector.broadcast %117 : vector<1x256xf32> to vector<8x256xf32>
    %175 = arith.mulf %173, %174 : vector<8x256xf32>
    %176 = tpu.concatenate %154, %157, %160, %163, %150, %166, %169, %172, %175 in 0 : vector<8x256xf32>, vector<8x256xf32>, vector<8x256xf32>, vector<8x256xf32>, vector<8x256xf32>, vector<8x256xf32>, vector<8x256xf32>, vector<8x256xf32>, vector<8x256xf32> -> vector<72x256xf32>
    %cst_52 = arith.constant dense<0.000000e+00> : vector<8x256xf32>
    %177 = tpu.matmul %151, %176, %cst_52 {dimension_numbers = #tpu.dot_dimension_numbers<[1], [0], [0], [1], [0, 0, 1, 1], [], []>} : vector<8x72xf32>, vector<72x256xf32>, vector<8x256xf32> -> vector<8x256xf32>
    %c0_53 = arith.constant 0 : index
    %c0_54 = arith.constant 0 : index
    %178 = vector.load %arg5[%c0_53, %c0_54] : memref<8x1xf32, #tpu.memory_space<vmem>>, vector<8x1xf32>
    %179 = vector.broadcast %178 : vector<8x1xf32> to vector<8x256xf32>
    %180 = arith.addf %177, %179 : vector<8x256xf32>
    %c0_55 = arith.constant 0 : index
    %c0_56 = arith.constant 0 : index
    %181 = vector.load %arg6[%c0_55, %c0_56] : memref<256x1024xf32, #tpu.memory_space<vmem>>, vector<256x1024xf32>
    %cst_57 = arith.constant dense<0.000000e+00> : vector<8x1024xf32>
    %182 = tpu.matmul %180, %181, %cst_57 {dimension_numbers = #tpu.dot_dimension_numbers<[1], [0], [0], [1], [0, 0, 1, 1], [], []>} : vector<8x256xf32>, vector<256x1024xf32>, vector<8x1024xf32> -> vector<8x1024xf32>
    %183 = vector.extract_strided_slice %182 {offsets = [0, 0], sizes = [2, 1024], strides = [1, 1]} : vector<8x1024xf32> to vector<2x1024xf32>
    %c0_58 = arith.constant 0 : index
    %c0_59 = arith.constant 0 : index
    %c0_60 = arith.constant 0 : index
    %184 = vector.load %arg7[%c0_58, %c0_59, %c0_60] : memref<1x2x1024xf32, #tpu.memory_space<vmem>>, vector<1x2x1024xf32>
    %185 = vector.shape_cast %184 : vector<1x2x1024xf32> to vector<2x1024xf32>
    %186 = vector.shape_cast %183 : vector<2x1024xf32> to vector<1x2x1024xf32>
    tpu.vector_store %arg7[%c0_58, %c0_59, %c0_60], %186 {strides = array<i32>} : memref<1x2x1024xf32, #tpu.memory_space<vmem>>, vector<1x2x1024xf32>,
    return
  }
  func.func @transform_0(%arg0: i32) -> (i32, i32) {
    %c0_i32 = arith.constant 0 : i32
    %c0_i32_0 = arith.constant 0 : i32
    return %c0_i32, %arg0 : i32, i32
  }
  func.func @transform_1(%arg0: i32) -> (i32, i32) {
    %c0_i32 = arith.constant 0 : i32
    %c0_i32_0 = arith.constant 0 : i32
    %c0_i32_1 = arith.constant 0 : i32
    return %c0_i32, %c0_i32_0 : i32, i32
  }
  func.func @transform_2(%arg0: i32) -> (i32, i32) {
    %c0_i32 = arith.constant 0 : i32
    %c0_i32_0 = arith.constant 0 : i32
    %c0_i32_1 = arith.constant 0 : i32
    return %c0_i32, %c0_i32_0 : i32, i32
  }
  func.func @transform_3(%arg0: i32) -> (i32, i32) {
    %c0_i32 = arith.constant 0 : i32
    %c0_i32_0 = arith.constant 0 : i32
    %c0_i32_1 = arith.constant 0 : i32
    return %c0_i32, %c0_i32_0 : i32, i32
  }
  func.func @transform_4(%arg0: i32) -> (i32, i32) {
    %c0_i32 = arith.constant 0 : i32
    %c0_i32_0 = arith.constant 0 : i32
    %c0_i32_1 = arith.constant 0 : i32
    return %c0_i32, %c0_i32_0 : i32, i32
  }
  func.func @transform_5(%arg0: i32) -> (i32, i32) {
    %c0_i32 = arith.constant 0 : i32
    %c0_i32_0 = arith.constant 0 : i32
    %c0_i32_1 = arith.constant 0 : i32
    return %c0_i32, %c0_i32_0 : i32, i32
  }
  func.func @transform_6(%arg0: i32) -> (i32, i32, i32) {
    %c0_i32 = arith.constant 0 : i32
    %c0_i32_0 = arith.constant 0 : i32
    %c0_i32_1 = arith.constant 0 : i32
    return %arg0, %c0_i32, %c0_i32_0 : i32, i32, i32
  }
}

</mosaic_0001>

<bundles_post_ra>
// kernel: tpu_custom_call.1
= control target key start
LH: loop header
LB: loop body
LE: loop exit
PB: predicated region body
PF: predicated region fallthrough
CT: control target
= control target key end

     0   :  { %s2319_s0 = inlined_call_operand.hbm [shape: f32[8,512], index: 0, kind: input, shape index: {}]   ;;  %s2320_s1 = inlined_call_operand.vmem [shape: f32[8,72], index: 1, kind: input, shape index: {}]   ;;  %s2321_s2 = inlined_call_operand.vmem [shape: f32[8,1], index: 2, kind: input, shape index: {}]   ;;  %s2322_s3 = inlined_call_operand.vmem [shape: f32[8,72], index: 3, kind: input, shape index: {}]   ;;  %s2323_s4 = inlined_call_operand.vmem [shape: f32[8,1], index: 4, kind: input, shape index: {}]   ;;  %s2324_s5 = inlined_call_operand.hbm [shape: f32[256,1024], index: 5, kind: input, shape index: {}]   ;;  %s2325_s6 = inlined_call_operand.hbm [shape: f32[2,2,1024], index: 6, kind: output, shape index: {}]  }
   0x1   :  { %2338 = sst [smem:[#allocation11_spill]] %s2324_s5 }
   0x2   :  { %11 = vsyncpa [#allocation3], 0 }
   0x3   :  { %13 = vsyncpa [#allocation3 + $0x1], 0 }
   0x4   :  { %14 = vsyncpa [#allocation6], 0 }
   0x5   :  { %15 = vsyncpa [#allocation4], 0 }
   0x6   :  { %17 = vsyncpa [#allocation4 + $0x1], 0  ;;  %s1667_s21 = smov 0   ;;  %s1669_s22 = smov 0  }
   0x7   :  { %s1671_s23 = smov 0   ;;  %s1673_s24 = smov 0  }
   0x8 LB: > { %s1688_s25 = sadd.s32 4294967295, %s1614_s24   ;;  %s1385_s26 = sadd.s32 4294967294, %s1614_s24   ;;  %s1614_s24 = sphi %s1673_s24, %s2422_s24   ;;  %s1610_s23 = sphi %s1671_s23, %s2421_s23   ;;  %s1606_s22 = sphi %s1669_s22, %s2420_s22   ;;  %s1602_s21 = sphi %s1667_s21, %s2419_s21  }
   0x9   : > { %p43_p0 = scmp.ne.s32.totalorder %s1606_s22, %s1602_s21  ;;  %p2326_p1 = scmp.eq.s32.totalorder %s1688_s25, 0 }
   0xa   : > { %p178_p3 = scmp.eq.s32.totalorder %s1385_s26, 1  ;;  %p1386_p5 = scmp.ge.s32.totalorder %s1614_s24, 1 }
   0xb   : > { %p1697_p4 = por %p2326_p1, %p43_p0  ;;  %p185_p7 = scmp.lt.s32.totalorder %s1614_s24, 3 }
   0xc   : > { %p1702_p6 = por %p178_p3, %p43_p0  ;;  %s1616_s30 = smov [#allocation5]  }
   0xd   : > { %s2339_s27 = scalar_select %p1697_p4, 1, 0 }
   0xe   : > { %s2340_s28 = scalar_select %p1702_p6, 1, 0 }
   0xf   : > { %p1707_p8 = pnand %p1386_p5, %p185_p7  ;;  %s209_s7 = sshll.u32 %s1616_s30, 4  ;;  %s210_s7 = int_to_ptr.vmem [resolvable:$true] %s209_s7 }
  0x10   : > { %s1721_s9 = sadd.s32 1, %s1614_s24   ;;  %s30_s10 = sadd.s32 1, %s1610_s23 }
  0x11   : > { %s2341_s29 = scalar_select %p1707_p8, 1, 0 }
  0x12   : > { %p1429_p9 = pneg %p1707_p8  ;;  %s27_s11 = ssub.s32 %s1614_s24, %s1721_s9 }
  0x13   : > { %s1503_s12 = scalar_lea.vmem %s210_s7, 32768  ;;  %p1511_p5 = scmp.lt.s32.totalorder %s210_s7, %s210_s7 }
  0x14   : > { %p1716_p11 = pnand %p1429_p9, %p2326_p1  ;;  %p1504_p13 = scmp.ne.s32.totalorder %s210_s7, %s1503_s12 }
  0x15   : > { %p1512_p7 = scmp.lt.s32.totalorder %s1503_s12, %s1503_s12 }
  0x16   : > { %p1494_p12 = pneg %p1716_p11 }
  0x17   : > { %p1513_p10 = por %p1512_p7, %p1511_p5 }
  0x18   : > { %p1506_p0 = pnand %p1504_p13, %p1494_p12 }
  0x1a   : > { %p1507_p3 = pneg %p1506_p0 }
  0x1c   : > { %p1514_p2 = pnand %p1513_p10, %p1507_p3 }
  0x1e   : > { %1517 = shalt.err (!%p1514_p2)
}
  0x1f   : > { %s1617_s13 = smov 1024   ;;  %s1618_s14 = smov 64  }
  0x20   : > { %s2343_s5 = sld [smem:[#allocation11_spill]]  ;;  %p28_p9 = scmp.eq.s32.totalorder %s27_s11, 0 }
  0x21   : > { %p37_p12 = scmp.ne.s32.totalorder %s1610_s23, %s1606_s22  ;;  %p38_p10 = scmp.eq.s32.totalorder %s1614_s24, 0 }
  0x22   : > { %p1442_p2 = scmp.lt.s32.totalorder %s1614_s24, 2  ;;  %p2344_p0 = scmp.eq.s32.totalorder %s1688_s25, 1 }
  0x23   : > { %s1738_s17 = scalar_select %p28_p9, %s1610_s23, %s30_s10  }
  0x24   : > { %p39_p13 = por %p38_p10, %p37_p12  ;;  %p1742_p3 = por %p2344_p0, %p37_p12 }
  0x25   : > { %s223_s19 = sand.u32 1, %s1610_s23   ;;  %s1419_s20 = sshll.u32 %s1614_s24, 8 }
  0x26   : > { %1432 = dma.hbm_to_vmem [thread:$0]  (!%p1716_p11), %s2343_s5, 32768, %s210_s7, [#allocation6], %s1617_s13, %s1617_s13, %s1618_s14  }
  0x27   : > { %s2345_s18 = scalar_select %p1742_p3, 1, 0 }
  0x28   : > { %s1389_s26 = sshll.u32 %s223_s19, 4  ;;  %s1751_s12 = scalar_lea.hbm %s2319_s0, %s1419_s20 }
  0x29   : > { %s227_s7 = scalar_lea.vmem [#allocation2], %s1389_s26  ;;  %p1753_p11 = pnand %p1442_p2, %p39_p13 }
  0x2a   : > { %s235_s10 = sshll.u32 %s227_s7, 4  ;;  %s224_s13 = scalar_lea.sflag [#allocation3], %s223_s19  ;;  %s236_s10 = int_to_ptr.vmem [resolvable:$true] %s235_s10 }
  0x2b   : > { %s1518_s14 = scalar_lea.hbm %s1751_s12, 256  ;;  %p1520_p7 = pneg %p1753_p11 }
  0x2c   : > { %p1519_p5 = scmp.ne.s32.totalorder %s1751_s12, %s1518_s14  ;;  %s1523_s20 = scalar_lea.hbm %s2319_s0, 512 }
  0x2d   : > { %p1524_p10 = scmp.lt.s32.totalorder %s1751_s12, %s2319_s0  ;;  %p1525_p2 = scmp.lt.s32.totalorder %s1523_s20, %s1518_s14 }
  0x2e   : > { %p1521_p9 = pnand %p1520_p7, %p1519_p5 }
  0x2f   : > { %p1526_p13 = por %p1525_p2, %p1524_p10 }
  0x30   : > { %p1522_p12 = pneg %p1521_p9 }
  0x32   : > { %p1527_p0 = pnand %p1526_p13, %p1522_p12 }
  0x34   : > { %1530 = shalt.err (!%p1527_p0)
}
  0x35   : > { %s1531_s8 = scalar_lea.vmem %s236_s10, 256  ;;  %s1619_s19 = smov [#allocation2]  }
  0x36   : > { %p1532_p1 = scmp.ne.s32.totalorder %s236_s10, %s1531_s8  ;;  %s1536_s7 = sshll.u32 %s1619_s19, 4  ;;  %s1537_s7 = int_to_ptr.vmem [resolvable:$false] %s1536_s7 }
  0x37   : > { %s1538_s5 = scalar_lea.vmem %s1537_s7, 512  ;;  %p1539_p5 = scmp.lt.s32.totalorder %s236_s10, %s1537_s7 }
  0x38   : > { %p1534_p6 = pnand %p1532_p1, %p1520_p7  ;;  %p1540_p9 = scmp.lt.s32.totalorder %s1538_s5, %s1531_s8 }
  0x3a   : > { %p1535_p3 = pneg %p1534_p6  ;;  %p1541_p4 = por %p1540_p9, %p1539_p5 }
  0x3c   : > { %p1542_p8 = pnand %p1541_p4, %p1535_p3 }
  0x3e   : > { %1545 = shalt.err (!%p1542_p8)
}
  0x3f   : > { %1436 = dma.hbm_to_vmem [thread:$0]  (!%p1753_p11), %s1751_s12, 256, %s236_s10, %s224_s13  }
  0x40   : > { %p2347_p12 = scmp.ne.s32.totalorder %s2341_s29, 0 }
  0x41   : > { %s1774_s14 = sand.u32 (!%p2347_p12), 1, %s1606_s22   ;;  %p2348_p1 = scmp.ne.s32.totalorder (!%p2347_p12), %s2339_s27, 0 }
  0x42   : > { %244 = sbr.rel (%p2347_p12) target bundleno = 1051 (0x41b), region = 44  ;;  %s1393_s15 = sshll.u32 (!%p2347_p12), %s1774_s14, 4 }
  0x43   : > { %s247_s16 = scalar_lea.sflag (!%p2347_p12), [#allocation3], %s1774_s14  ;;  %s250_s5 = scalar_lea.vmem (!%p2347_p12), [#allocation2], %s1393_s15 }
  0x47   : > { %1589 = dma.done.wait (%p2348_p1), %s247_s16, 256  }
  0x48   : > { %1591 = vsyncadd (%p2348_p1), %s247_s16, 4294967040  ;;  %p2349_p4 = scmp.eq.s32.totalorder %s1688_s25, 0 }
  0x4a   : > { %1593 = dma.done.wait (%p2349_p4), [#allocation6], 32768   ;;  %p2350_p6 = pmov %p2349_p4 }
  0x4b   : > { %v1620_v0 = vmov 0.0   ;;  %v1790_v1 = vld [vmem:[%s250_s5] sm:$0xff]  ;;  %s1621_s29 = smov 112   ;;  %s1622_s12 = smov 111   ;;  %v1796_v2 = vld [vmem:[%s250_s5 + $0x8] sm:$0xff]  ;;  %v1627_v3 = vmov 0   ;;  %v284_v5 = vlaneseq }
  0x4c   : > { %1595 = vsyncadd (%p2350_p6), [#allocation6], 4294934528  ;;  %550 = vmatprep.mubr.f32.mxu0 %v1620_v0  ;;  %697 = vmatprep.mubr.f32.mxu1 %v1620_v0  ;;  %s1623_s27 = smov 113   ;;  %s1624_s10 = smov 127   ;;  %v476_v4 = vld [vmem:[%s2321_s2] sm:$0xff]  ;;  %v2365_v32 = vmov 0 }
  0x4d   : > { %458 = vrot.lane.b32.xlu1 %v1790_v1, %s1621_s29  ;;  %467 = vrot.lane.b32.xlu0 %v1790_v1, %s1622_s12  ;;  %s1625_s11 = smov 1   ;;  %s1626_s13 = smov 15   ;;  %v1830_v6 = vand.u32 127, %v284_v5  ;;  %v2368_v33 = vmov 0  ;;  %v401_v52 = vld [vmem:[%s2320_s1] sm:$0xff]  ;;  %v753_v27 = vld [vmem:[#allocation5 + $0x188] sm:$0xff] }
  0x4e   : > { %1491 = vset.pattern.permute.xlu0 %v1627_v3  ;;  %s1628_s20 = smov 16   ;;  %s1629_s30 = smov 17   ;;  %v624_v63 = vld [vmem:[%s2323_s4] sm:$0xff] }
  0x4f   : > { %v286_v7 = vadd.s32 128, %v1830_v6  ;;  %v287_v9 = vcvt.s32.f32 %v1830_v6  ;;  %p2416_p3 = scmp.ne.s32.totalorder %s2345_s18, 0  ;;  %s1631_s8 = smov [#allocation7]  }
  0x50   : > { %s1550_s19 = sshll.u32 %s1631_s8, 4  ;;  %s1551_s19 = int_to_ptr.vmem [resolvable:$false] %s1550_s19 }
  0x51   : > { %460 = vrot.lane.b32.xlu1 %v1796_v2, %s1621_s29  ;;  %469 = vrot.lane.b32.xlu0 %v1796_v2, %s1622_s12  ;;  %v288_v8 = vcvt.s32.f32 %v286_v7  ;;  %v290_v11 = vmul.f32 0.00390625, %v287_v9 }
  0x53   : > { %v291_v10 = vmul.f32 0.00390625, %v288_v8  ;;  %v292_v13 = vfloor.f32 %v290_v11 }
  0x55   : > { %451 = vrot.lane.b32.xlu1 %v1796_v2, %s1623_s27  ;;  %449 = vrot.lane.b32.xlu0 %v1790_v1, %s1623_s27  ;;  %v293_v12 = vfloor.f32 %v291_v10  ;;  %v294_v15 = vmul.f32 256.0, %v292_v13  ;;  %v793_v13 = vld [vmem:[#allocation5 + $0x2c8] sm:$0xff] }
  0x57   : > { %v295_v14 = vmul.f32 256.0, %v293_v12  ;;  %v296_v17 = vsub.f32 %v287_v9, %v294_v15 }
  0x59   : > { %442 = vrot.lane.b32.xlu1 %v1796_v2, %s1624_s10  ;;  %440 = vrot.lane.b32.xlu0 %v1790_v1, %s1624_s10  ;;  %v297_v16 = vsub.f32 %v288_v8, %v295_v14  ;;  %v299_v19 = vmul.f32 0.0625, %v296_v17 }
  0x5b   : > { %v300_v18 = vmul.f32 0.0625, %v297_v16  ;;  %v1836_v21 = vfloor.f32 %v299_v19 }
  0x5d   : > { %433 = vrot.lane.b32.xlu1 %v1796_v2, %s1625_s11  ;;  %431 = vrot.lane.b32.xlu0 %v1790_v1, %s1625_s11  ;;  %v1834_v20 = vfloor.f32 %v300_v18  ;;  %v303_v23 = vmul.f32 16.0, %v1836_v21  ;;  %vm371_vm2 = vcmp.ge.f32.partialorder %v1836_v21, -1.0  ;;  %vm373_vm3 = vcmp.le.f32.partialorder %v1836_v21, 14.0 }
  0x5e   : > { %vm349_vm4 = vcmp.ge.f32.partialorder %v1836_v21, 0.0  ;;  %vm351_vm5 = vcmp.le.f32.partialorder %v1836_v21, 15.0  ;;  %vm1855_vm8 = vmand %vm371_vm2, %vm373_vm3 }
  0x5f   : > { %v304_v22 = vmul.f32 16.0, %v1834_v20  ;;  %vm372_vm0 = vcmp.ge.f32.partialorder %v1834_v20, -1.0  ;;  %vm374_vm1 = vcmp.le.f32.partialorder %v1834_v20, 14.0  ;;  %v1844_v25 = vsub.f32 %v296_v17, %v303_v23  ;;  %vm1861_vm11 = vmand %vm349_vm4, %vm351_vm5 }
  0x60   : > { %vm1851_vm7 = vmand %vm372_vm0, %vm374_vm1  ;;  %vm350_vm13 = vcmp.ge.f32.partialorder %v1834_v20, 0.0  ;;  %vm352_vm14 = vcmp.le.f32.partialorder %v1834_v20, 15.0 }
  0x61   : > { %424 = vrot.lane.b32.xlu1 %v1796_v2, %s1626_s13  ;;  %422 = vrot.lane.b32.xlu0 %v1790_v1, %s1626_s13  ;;  %v1840_v24 = vsub.f32 %v297_v16, %v304_v22  ;;  %vm2332_vm10 = vcmp.ge.f32.partialorder %v1844_v25, 0.0  ;;  %vm2334_vm4 = vcmp.ge.f32.partialorder %v1844_v25, 1.0  ;;  %vm2364_vm5 = vcmp.le.f32.partialorder %v1844_v25, 15.0  ;;  %v784_v16 = vld [vmem:[#allocation5 + $0x280] sm:$0xff] }
  0x62   : > { %vm385_vm3 = vmand %vm1855_vm8, %vm2332_vm10 }
  0x63   : > { %vm2330_vm6 = vcmp.ge.f32.partialorder %v1840_v24, 0.0  ;;  %vm2331_vm9 = vcmp.ge.f32.partialorder %v1840_v24, -1.0  ;;  %vm2333_vm15 = vcmp.le.f32.partialorder %v1840_v24, 15.0  ;;  %vm2336_vm10 = vcmp.ge.f32.partialorder %v1840_v24, 1.0 }
  0x64   : > { %vm386_vm12 = vmand %vm1851_vm7, %vm2330_vm6 }
  0x65   : > { %415 = vrot.lane.b32.xlu1 %v1796_v2, %s1628_s20  ;;  %413 = vrot.lane.b32.xlu0 %v1790_v1, %s1628_s20  ;;  %vm394_vm1 = vmand %vm1851_vm7, %vm2331_vm9  ;;  %vm2361_vm9 = vcmp.le.f32.partialorder %v1840_v24, 14.0 }
  0x66   : > { %vm1884_vm6 = vmand %vm350_vm13, %vm352_vm14  ;;  %vm2335_vm14 = vcmp.le.f32.partialorder %v1844_v25, 16.0 }
  0x67   : > { %vm1890_vm0 = vmand %vm386_vm12, %vm2333_vm15 }
  0x68   : > { %vm1896_vm2 = vmand %vm394_vm1, %vm2361_vm9  ;;  %vm341_vm9 = vcmp.le.f32.partialorder %v1844_v25, 14.0  ;;  %vm2367_vm1 = vcmp.ge.f32.partialorder %v1844_v25, -1.0  ;;  %v1974_v43 = vsel %vm1890_vm0, 1.0, %v1620_v0 }
  0x69   : > { %406 = vrot.lane.b32.xlu1 %v1796_v2, %s1629_s30  ;;  %404 = vrot.lane.b32.xlu0 %v1790_v1, %s1629_s30  ;;  %vm1903_vm13 = vmand %vm385_vm3, %vm2364_vm5  ;;  %v1949_v37 = vsel %vm1896_vm2, 1.0, %v1620_v0  ;;  %vm307_vm2 = vcmp.ge.f32.partialorder %v1836_v21, 1.0 }
  0x6a   : > { %v2366_v32 = vsel %vm1903_vm13, 4294967295, %v2365_v32  ;;  %vm377_vm12 = vmand %vm1855_vm8, %vm2334_vm4  ;;  %vm2337_vm4 = vcmp.le.f32.partialorder %v1840_v24, 16.0 }
  0x6b   : > { %vm393_vm15 = vmand %vm1855_vm8, %vm2367_vm1  ;;  %vm2382_vm0 = vnez %v2366_v32 }
  0x6c   : > { %vm378_vm3 = vmand %vm1851_vm7, %vm2336_vm10  ;;  %vm2371_vm7 = vcmp.ge.f32.partialorder %v1840_v24, -1.0  ;;  %vm471_vm10 = vcmp.lt.s32.totalorder %v1830_v6, 111  ;;  %v1993_v48 = vsel %vm2382_vm0, 1.0, %v1620_v0 }
  0x6d   : > { %479 = vperm.xlu0 %1491, %v476_v4   ;;  %vm1923_vm5 = vmand %vm377_vm12, %vm2335_vm14  ;;  %vm462_vm14 = vcmp.lt.s32.totalorder %v1830_v6, 112 }
  0x6e   : > { %v2369_v33 = vsel %vm1923_vm5, 4294967295, %v2368_v33  ;;  %vm395_vm13 = vmand %vm393_vm15, %vm341_vm9  ;;  %vm310_vm15 = vcmp.le.f32.partialorder %v1834_v20, 16.0 }
  0x6f   : > { %vm2370_vm8 = vmmov %vm2367_vm1  ;;  %v1953_v38 = vsel %vm395_vm13, 1.0, %v1620_v0  ;;  %vm309_vm13 = vcmp.le.f32.partialorder %v1836_v21, 16.0 }
  0x70   : > { %vm363_vm1 = vmand %vm1861_vm11, %vm2370_vm8 }
  0x71   : > { %vm364_vm12 = vmand %vm1884_vm6, %vm2371_vm7 }
  0x72   : > { %vm1942_vm5 = vmand %vm378_vm3, %vm2337_vm4  ;;  %vm2376_vm3 = vcmp.le.f32.partialorder %v1840_v24, 14.0  ;;  %vm308_vm4 = vcmp.ge.f32.partialorder %v1834_v20, 1.0 }
  0x73   : > { %vm1957_vm8 = vmand %vm363_vm1, %vm341_vm9  ;;  %vm2379_vm1 = vcmp.ge.f32.partialorder %v1844_v25, 1.0  ;;  %v2015_v54 = vsel %vm1942_vm5, 1.0, %v1620_v0  ;;  %vm2391_vm5 = vcmp.lt.s32.totalorder %v1830_v6, 113 }
  0x74   : > { %vm1963_vm7 = vmand %vm364_vm12, %vm2376_vm3  ;;  %vm2383_vm3 = vcmp.ge.f32.partialorder %v1840_v24, 1.0  ;;  %v2055_v7 = vsel %vm1957_vm8, 1.0, %v1620_v0 }
  0x75   : > { %vm1986_vm12 = vmand %vm1861_vm11, %vm2379_vm1  ;;  %vm2386_vm1 = vnez %v2369_v33  ;;  %v2060_v8 = vsel %vm1963_vm7, 1.0, %v1620_v0  ;;  %vm435_vm7 = vcmp.lt.s32.totalorder %v1830_v6, 1 }
  0x76   : > { %vm2003_vm11 = vmand %vm1884_vm6, %vm2383_vm3  ;;  %v2010_v53 = vsel %vm2386_vm1, 1.0, %v1620_v0 }
  0x77   : > { %vm2019_vm0 = vmand %vm307_vm2, %vm309_vm13  ;;  %vm2393_vm13 = vcmp.le.f32.partialorder %v1844_v25, 16.0 }
  0x78   : > { %vm2028_vm6 = vmand %vm308_vm4, %vm310_vm15  ;;  %vm444_vm4 = vcmp.lt.s32.totalorder %v1830_v6, 127  ;;  %vm2396_vm15 = vcmp.ge.f32.partialorder %v1844_v25, -1.0 }
  0x79   : > { %vm2392_vm2 = vmmov %vm2391_vm5 }
  0x7a   : > { %vm2041_vm3 = vmand %vm1986_vm12, %vm2393_vm13  ;;  %vm2397_vm12 = vcmp.ge.f32.partialorder %v1840_v24, -1.0 }
  0x7b   : > { %vm339_vm1 = vmand %vm2019_vm0, %vm2396_vm15  ;;  %v2092_v17 = vsel %vm2041_vm3, 1.0, %v1620_v0  ;;  %vm426_vm3 = vcmp.lt.s32.totalorder %v1830_v6, 15 }
  0x7c   : > { %vm2076_vm8 = vmand %vm339_vm1, %vm341_vm9  ;;  %vm2404_vm9 = vcmp.ge.f32.partialorder %v1844_v25, 0.0 }
  0x7d   : > { %vm327_vm1 = vmand %vm2019_vm0, %vm2404_vm9  ;;  %v2123_v28 = vsel %vm2076_vm8, 1.0, %v1620_v0  ;;  %vm2411_vm8 = vcmp.ge.f32.partialorder %v1840_v24, 1.0 }
  0xbf   : > { %v459_v34 = vpop.permute.xlu1 %458  ;;  %v468_v35 = vpop.permute.xlu0 %467 }
  0xc3   : > { %v461_v40 = vpop.permute.xlu1 %460  ;;  %v470_v41 = vpop.permute.xlu0 %469 }
  0xc4   : > { %v464_v44 = vsel %vm462_vm14, %v461_v40, %v459_v34  ;;  %v472_v45 = vsel %vm471_vm10, %v468_v35, %v470_v41  ;;  %v473_v46 = vsel %vm471_vm10, %v470_v41, %v468_v35  ;;  %v463_v49 = vsel %vm462_vm14, %v459_v34, %v461_v40 }
  0xc5   : > { %v475_v50 = vmul.f32 %v1949_v37, %v473_v46  ;;  %v474_v51 = vmul.f32 %v1953_v38, %v472_v45  ;;  %v466_v56 = vmul.f32 %v1974_v43, %v464_v44  ;;  %v465_v60 = vmul.f32 %v1993_v48, %v463_v49 }
  0xc7   : > { %v452_v57 = vpop.permute.xlu1 %451  ;;  %500 = vmatprep.subr.mxu0 %v475_v50  ;;  %v450_v58 = vpop.permute.xlu0 %449 }
  0xc8   : > { %v454_v61 = vsel %vm2391_vm5, %v450_v58, %v452_v57  ;;  %v455_v62 = vsel %vm2392_vm2, %v452_v57, %v450_v58  ;;  %501 = vmatpush1.msra.mxu0 %v474_v51  ;;  %vm340_vm5 = vmand %vm2028_vm6, %vm2397_vm12  ;;  %vm2398_vm2 = vcmp.le.f32.partialorder %v1840_v24, 16.0  ;;  %vm2405_vm12 = vcmp.ge.f32.partialorder %v1840_v24, 0.0 }
  0xc9   : > { %v456_v3 = vmul.f32 %v2010_v53, %v454_v61  ;;  %v457_v4 = vmul.f32 %v2015_v54, %v455_v62  ;;  %502 = vmatprep.subr.mxu0 %v466_v56  ;;  %vm358_vm13 = vmand %vm2003_vm11, %vm2398_vm2  ;;  %vm2401_vm11 = vcmp.le.f32.partialorder %v1840_v24, 14.0  ;;  %vm2406_vm2 = vcmp.le.f32.partialorder %v1844_v25, 15.0  ;;  %v825_v61 = vld [vmem:[#allocation5 + $0x3c8] sm:$0xff]  ;;  %v824_v62 = vld [vmem:[#allocation5 + $0x3c0] sm:$0xff] }
  0xca   : > { %503 = vmatpush1.msra.mxu0 %v465_v60  ;;  %vm2085_vm15 = vmand %vm340_vm5, %vm2401_vm11  ;;  %v2095_v18 = vsel %vm358_vm13, 1.0, %v1620_v0  ;;  %vm2409_vm11 = vcmp.le.f32.partialorder %v1840_v24, 15.0 }
  0xcb   : > { %v443_v9 = vpop.permute.xlu1 %442  ;;  %504 = vmatprep.subr.mxu0 %v457_v4  ;;  %v441_v10 = vpop.permute.xlu0 %440  ;;  %vm328_vm5 = vmand %vm2028_vm6, %vm2405_vm12  ;;  %v2128_v29 = vsel %vm2085_vm15, 1.0, %v1620_v0  ;;  %v816_v4 = vld [vmem:[#allocation5 + $0x380] sm:$0xff] }
  0xcc   : > { %v445_v11 = vsel %vm444_vm4, %v441_v10, %v443_v9  ;;  %v446_v12 = vsel %vm444_vm4, %v443_v9, %v441_v10  ;;  %505 = vmatpush1.msra.mxu0 %v456_v3  ;;  %vm2115_vm13 = vmand %vm327_vm1, %vm2406_vm2  ;;  %vm2410_vm1 = vcmp.ge.f32.partialorder %v1844_v25, 1.0  ;;  %v817_v3 = vld [vmem:[#allocation5 + $0x388] sm:$0xff]  ;;  %v808_v10 = vld [vmem:[#allocation5 + $0x340] sm:$0xff] }
  0xcd   : > { %v447_v14 = vmul.f32 %v2055_v7, %v445_v11  ;;  %v448_v15 = vmul.f32 %v2060_v8, %v446_v12  ;;  %vm332_vm9 = vmand %vm328_vm5, %vm2409_vm11  ;;  %vm417_vm5 = vcmp.lt.s32.totalorder %v1830_v6, 16  ;;  %v2150_v34 = vsel %vm2115_vm13, 1.0, %v1620_v0  ;;  %v809_v9 = vld [vmem:[#allocation5 + $0x348] sm:$0xff]  ;;  %v800_v12 = vld [vmem:[#allocation5 + $0x300] sm:$0xff] }
  0xce   : > { %vm315_vm12 = vmand %vm2019_vm0, %vm2410_vm1  ;;  %v2153_v35 = vsel %vm332_vm9, 1.0, %v1620_v0  ;;  %vm2412_vm0 = vcmp.le.f32.partialorder %v1844_v25, 16.0  ;;  %vm408_vm13 = vcmp.lt.s32.totalorder %v1830_v6, 17  ;;  %vm482_vm9 = vcmask 588800   ;;  %v801_v11 = vld [vmem:[#allocation5 + $0x308] sm:$0xff] }
  0xcf   : > { %v434_v19 = vpop.permute.xlu1 %433  ;;  %506 = vmatprep.subr.mxu0 %v448_v15  ;;  %v432_v20 = vpop.permute.xlu0 %431  ;;  %vm316_vm15 = vmand %vm2028_vm6, %vm2411_vm8  ;;  %vm2413_vm6 = vcmp.le.f32.partialorder %v1840_v24, 16.0  ;;  %v785_v15 = vld [vmem:[#allocation5 + $0x288] sm:$0xff] }
  0xd0   : > { %v436_v21 = vsel %vm435_vm7, %v432_v20, %v434_v19  ;;  %v437_v22 = vsel %vm435_vm7, %v434_v19, %v432_v20  ;;  %507 = vmatpush1.msra.mxu0 %v447_v14  ;;  %vm319_vm2 = vmand %vm315_vm12, %vm2412_vm0  ;;  %v792_v14 = vld [vmem:[#allocation5 + $0x2c0] sm:$0xff]  ;;  %v777_v19 = vld [vmem:[#allocation5 + $0x248] sm:$0xff] }
  0xd1   : > { %v438_v23 = vmul.f32 %v2092_v17, %v437_v22  ;;  %v439_v26 = vmul.f32 %v2095_v18, %v436_v21  ;;  %508 = vmatprep.subr.mxu0 %v1796_v2  ;;  %vm320_vm11 = vmand %vm316_vm15, %vm2413_vm6  ;;  %v2167_v25 = vsel %vm319_vm2, 1.0, %v1620_v0  ;;  %v776_v20 = vld [vmem:[#allocation5 + $0x240] sm:$0xff]  ;;  %v769_v21 = vld [vmem:[#allocation5 + $0x208] sm:$0xff] }
  0xd2   : > { %509 = vmatpush1.msra.mxu0 %v1790_v1  ;;  %v2170_v45 = vsel %vm320_vm11, 1.0, %v1620_v0  ;;  %v768_v22 = vld [vmem:[#allocation5 + $0x200] sm:$0xff] }
  0xd3   : > { %v425_v2 = vpop.permute.xlu1 %424  ;;  %510 = vmatprep.subr.mxu0 %v439_v26  ;;  %v423_v30 = vpop.permute.xlu0 %422  ;;  %v760_v26 = vld [vmem:[#allocation5 + $0x1c0] sm:$0xff] }
  0xd4   : > { %v427_v1 = vsel %vm426_vm3, %v423_v30, %v425_v2  ;;  %v428_v31 = vsel %vm426_vm3, %v425_v2, %v423_v30  ;;  %511 = vmatpush1.msra.mxu0 %v438_v23  ;;  %v761_v23 = vld [vmem:[#allocation5 + $0x1c8] sm:$0xff]  ;;  %v752_v2 = vld [vmem:[#allocation5 + $0x180] sm:$0xff] }
  0xd5   : > { %v429_v32 = vmul.f32 %v2123_v28, %v428_v31  ;;  %v430_v33 = vmul.f32 %v2128_v29, %v427_v1  ;;  %v745_v30 = vld [vmem:[#allocation5 + $0x148] sm:$0xff]  ;;  %v744_v1 = vld [vmem:[#allocation5 + $0x140] sm:$0xff] }
  0xd6   : > { %v737_v31 = vld [vmem:[#allocation5 + $0x108] sm:$0xff] }
  0xd7   : > { %v416_v36 = vpop.permute.xlu1 %415  ;;  %512 = vmatprep.subr.mxu0 %v430_v33  ;;  %v414_v39 = vpop.permute.xlu0 %413  ;;  %v729_v33 = vld [vmem:[#allocation5 + $0xc8] sm:$0xff] }
  0xd8   : > { %v418_v40 = vsel %vm417_vm5, %v414_v39, %v416_v36  ;;  %v419_v41 = vsel %vm417_vm5, %v416_v36, %v414_v39  ;;  %513 = vmatpush1.msra.mxu0 %v429_v32  ;;  %v736_v32 = vld [vmem:[#allocation5 + $0x100] sm:$0xff]  ;;  %v721_v39 = vld [vmem:[#allocation5 + $0x88] sm:$0xff] }
  0xd9   : > { %v420_v42 = vmul.f32 %v2150_v34, %v419_v41  ;;  %v421_v44 = vmul.f32 %v2153_v35, %v418_v40  ;;  %v728_v36 = vld [vmem:[#allocation5 + $0xc0] sm:$0xff]  ;;  %v713_v41 = vld [vmem:[#allocation5 + $0x48] sm:$0xff] }
  0xda   : > { %v720_v40 = vld [vmem:[#allocation5 + $0x80] sm:$0xff] }
  0xdb   : > { %v407_v24 = vpop.permute.xlu1 %406  ;;  %514 = vmatprep.subr.mxu0 %v421_v44  ;;  %v405_v46 = vpop.permute.xlu0 %404  ;;  %v705_v44 = vld [vmem:[#allocation5 + $0x8] sm:$0xff] }
  0xdc   : > { %v409_v47 = vsel %vm408_vm13, %v405_v46, %v407_v24  ;;  %v410_v49 = vsel %vm408_vm13, %v407_v24, %v405_v46  ;;  %515 = vmatpush1.msra.mxu0 %v420_v42  ;;  %v712_v42 = vld [vmem:[#allocation5 + $0x40] sm:$0xff]  ;;  %v953_v46 = vld [vmem:[#allocation5 + $0x7c8] sm:$0xff] }
  0xdd   : > { %v411_v50 = vmul.f32 %v2167_v25, %v410_v49  ;;  %v412_v51 = vmul.f32 %v2170_v45, %v409_v47  ;;  %v704_v24 = vld [vmem:[#allocation5] sm:$0xff]  ;;  %v945_v49 = vld [vmem:[#allocation5 + $0x788] sm:$0xff] }
  0xde   : > { %v952_v47 = vld [vmem:[#allocation5 + $0x7c0] sm:$0xff] }
  0xdf   : > { %516 = vmatprep.subr.mxu0 %v412_v51  ;;  %v937_v51 = vld [vmem:[#allocation5 + $0x748] sm:$0xff] }
  0xe0   : > { %517 = vmatpush1.msra.mxu0 %v411_v50  ;;  %v944_v50 = vld [vmem:[#allocation5 + $0x780] sm:$0xff] }
  0xe1   : > { %1412 = vmatmul.mubr.msk.f32.vlgmr.msra.gmra.mxu0 %vm482_vm9, %v401_v52  ;;  %960 = vmatprep.subr.mxu0 %v825_v61  ;;  %v936_v52 = vld [vmem:[#allocation5 + $0x740] sm:$0xff] }
  0xe2   : > { %961 = vmatpush1.msra.mxu0 %v824_v62  ;;  %v912_v61 = vld [vmem:[#allocation5 + $0x680] sm:$0xff]  ;;  %v905_v62 = vld [vmem:[#allocation5 + $0x648] sm:$0xff] }
  0xe3   : > { %962 = vmatprep.subr.mxu0 %v817_v3  ;;  %v897_v3 = vld [vmem:[#allocation5 + $0x608] sm:$0xff] }
  0xe4   : > { %963 = vmatpush1.msra.mxu0 %v816_v4  ;;  %v896_v4 = vld [vmem:[#allocation5 + $0x600] sm:$0xff] }
  0xe5   : > { %964 = vmatprep.subr.mxu0 %v809_v9  ;;  %v889_v9 = vld [vmem:[#allocation5 + $0x5c8] sm:$0xff] }
  0xe6   : > { %965 = vmatpush1.msra.mxu0 %v808_v10  ;;  %v888_v10 = vld [vmem:[#allocation5 + $0x5c0] sm:$0xff] }
  0xe7   : > { %966 = vmatprep.subr.mxu0 %v801_v11  ;;  %v881_v11 = vld [vmem:[#allocation5 + $0x588] sm:$0xff] }
  0xe8   : > { %v480_v0 = vpop.permute.xlu0 %479  ;;  %967 = vmatpush1.msra.mxu0 %v800_v12  ;;  %v880_v12 = vld [vmem:[#allocation5 + $0x580] sm:$0xff] }
  0xe9   : > { %968 = vmatprep.subr.mxu0 %v793_v13  ;;  %v873_v13 = vld [vmem:[#allocation5 + $0x548] sm:$0xff] }
  0xea   : > { %969 = vmatpush1.msra.mxu0 %v792_v14  ;;  %v872_v14 = vld [vmem:[#allocation5 + $0x540] sm:$0xff] }
  0xeb   : > { %970 = vmatprep.subr.mxu0 %v785_v15  ;;  %v865_v15 = vld [vmem:[#allocation5 + $0x508] sm:$0xff] }
  0xec   : > { %971 = vmatpush1.msra.mxu0 %v784_v16  ;;  %v864_v16 = vld [vmem:[#allocation5 + $0x500] sm:$0xff] }
  0xed   : > { %972 = vmatprep.subr.mxu0 %v777_v19  ;;  %v857_v19 = vld [vmem:[#allocation5 + $0x4c8] sm:$0xff] }
  0xee   : > { %973 = vmatpush1.msra.mxu0 %v776_v20  ;;  %v856_v20 = vld [vmem:[#allocation5 + $0x4c0] sm:$0xff] }
  0xef   : > { %974 = vmatprep.subr.mxu0 %v769_v21  ;;  %v849_v21 = vld [vmem:[#allocation5 + $0x488] sm:$0xff] }
  0xf0   : > { %975 = vmatpush1.msra.mxu0 %v768_v22 }
  0xf1   : > { %976 = vmatprep.subr.mxu0 %v761_v23 }
  0xf2   : > { %977 = vmatpush1.msra.mxu0 %v760_v26 }
  0xf3   : > { %978 = vmatprep.subr.mxu0 %v753_v27 }
  0xf4   : > { %979 = vmatpush1.msra.mxu0 %v752_v2 }
  0xf5   : > { %980 = vmatprep.subr.mxu0 %v745_v30 }
  0xf6   : > { %981 = vmatpush1.msra.mxu0 %v744_v1 }
  0xf7   : > { %982 = vmatprep.subr.mxu0 %v737_v31 }
  0xf8   : > { %983 = vmatpush1.msra.mxu0 %v736_v32 }
  0xf9   : > { %984 = vmatprep.subr.mxu0 %v729_v33 }
  0xfa   : > { %985 = vmatpush1.msra.mxu0 %v728_v36 }
  0xfb   : > { %986 = vmatprep.subr.mxu0 %v721_v39 }
  0xfc   : > { %987 = vmatpush1.msra.mxu0 %v720_v40 }
  0xfd   : > { %988 = vmatprep.subr.mxu0 %v713_v41 }
  0xfe   : > { %989 = vmatpush1.msra.mxu0 %v712_v42 }
  0xff   : > { %990 = vmatprep.subr.mxu0 %v705_v44 }
 0x100   : > { %991 = vmatpush1.msra.mxu0 %v704_v24 }
 0x101   : > { %992 = vmatprep.subr.mxu0 %v953_v46 }
 0x102   : > { %993 = vmatpush2.msra.mxu0 %v952_v47 }
 0x103   : > { %994 = vmatprep.subr.mxu0 %v945_v49 }
 0x104   : > { %995 = vmatpush2.msra.mxu0 %v944_v50 }
 0x105   : > { %996 = vmatprep.subr.mxu0 %v937_v51 }
 0x106   : > { %997 = vmatpush2.msra.mxu0 %v936_v52 }
 0x1a1   : > { %v552_v55 = vpop.f32.mrf.mxu0 }
 0x1a2   : > { %v553_v56 = vadd.f32 %v552_v55, %v480_v0  ;;  %v928_v55 = vld [vmem:[#allocation5 + $0x700] sm:$0xff] }
 0x1a3   : > { %v554_v57 = vpop.f32.mrf.mxu0 }
 0x1a4   : > { %v2182_v58 = vmax.f32 %v553_v56, 0.0  ;;  %v555_v59 = vadd.f32 %v554_v57, %v480_v0  ;;  %v929_v0 = vld [vmem:[#allocation5 + $0x708] sm:$0xff]  ;;  %v920_v57 = vld [vmem:[#allocation5 + $0x6c0] sm:$0xff] }
 0x1a5   : > { %v921_v56 = vld [vmem:[#allocation5 + $0x6c8] sm:$0xff]  ;;  %998 = vmatprep.subr.mxu0 %v929_v0 }
 0x1a6   : > { %608 = vrot.lane.b32.xlu0 %v2182_v58, %s1621_s29  ;;  %616 = vrot.lane.b32.xlu1 %v2182_v58, %s1622_s12  ;;  %v2188_v60 = vmax.f32 %v555_v59, 0.0  ;;  %v913_v59 = vld [vmem:[#allocation5 + $0x688] sm:$0xff] }
 0x1a7   : > { %999 = vmatpush2.msra.mxu0 %v928_v55 }
 0x1a8   : > { %1000 = vmatprep.subr.mxu0 %v921_v56 }
 0x1a9   : > { %1001 = vmatpush2.msra.mxu0 %v920_v57 }
 0x1aa   : > { %600 = vrot.lane.b32.xlu0 %v2182_v58, %s1623_s27  ;;  %618 = vrot.lane.b32.xlu1 %v2188_v60, %s1622_s12 }
 0x1ab   : > { %1002 = vmatprep.subr.mxu0 %v913_v59 }
 0x1ac   : > { %1003 = vmatpush2.msra.mxu0 %v912_v61 }
 0x1ad   : > { %1004 = vmatprep.subr.mxu0 %v905_v62 }
 0x1ae   : > { %592 = vrot.lane.b32.xlu0 %v2182_v58, %s1624_s10  ;;  %610 = vrot.lane.b32.xlu1 %v2188_v60, %s1621_s29 }
 0x1b2   : > { %584 = vrot.lane.b32.xlu0 %v2182_v58, %s1625_s11  ;;  %602 = vrot.lane.b32.xlu1 %v2188_v60, %s1623_s27  ;;  %s282_s27 = scalar_lea.vmem [#allocation7], %s1393_s15  ;;  %s1291_s15 = scalar_lea.sflag [#allocation4], %s1774_s14 }
 0x1b6   : > { %576 = vrot.lane.b32.xlu0 %v2182_v58, %s1626_s13  ;;  %594 = vrot.lane.b32.xlu1 %v2188_v60, %s1624_s10  ;;  %s1420_s10 = sshll.u32 %s1688_s25, 8  ;;  %s1552_s25 = scalar_lea.vmem %s1551_s19, 512 }
 0x1ba   : > { %568 = vrot.lane.b32.xlu0 %v2182_v58, %s1628_s20  ;;  %586 = vrot.lane.b32.xlu1 %v2188_v60, %s1625_s11  ;;  %s1305_s11 = sshll.u32 %s282_s27, 4  ;;  %s1306_s11 = int_to_ptr.vmem [resolvable:$true] %s1305_s11 }
 0x1bb   : > { %s1546_s26 = scalar_lea.vmem %s1306_s11, 256  ;;  %p1553_p10 = scmp.lt.s32.totalorder %s1306_s11, %s1551_s19 }
 0x1bc   : > { %p1547_p8 = scmp.ne.s32.totalorder %s1306_s11, %s1546_s26  ;;  %p1554_p2 = scmp.lt.s32.totalorder %s1552_s25, %s1546_s26 }
 0x1be   : > { %560 = vrot.lane.b32.xlu0 %v2182_v58, %s1629_s30  ;;  %578 = vrot.lane.b32.xlu1 %v2188_v60, %s1626_s13  ;;  %p1548_p11 = pnand %p1547_p8, %p2416_p3  ;;  %p1555_p13 = por %p1554_p2, %p1553_p10 }
 0x1c0   : > { %p1549_p7 = pneg %p1548_p11 }
 0x1c2   : > { %627 = vperm.xlu0 %1491, %v624_v63   ;;  %570 = vrot.lane.b32.xlu1 %v2188_v60, %s1628_s20  ;;  %v904_v63 = vld [vmem:[#allocation5 + $0x640] sm:$0xff]  ;;  %p1556_p0 = pnand %p1555_p13, %p1549_p7 }
 0x1c3   : > { %1005 = vmatpush2.msra.mxu0 %v904_v63 }
 0x1c4   : > { %1006 = vmatprep.subr.mxu0 %v897_v3 }
 0x1c5   : > { %1007 = vmatpush2.msra.mxu0 %v896_v4 }
 0x1c6   : > { %562 = vrot.lane.b32.xlu1 %v2188_v60, %s1629_s30  ;;  %1008 = vmatprep.subr.mxu0 %v889_v9  ;;  %s1303_s30 = scalar_lea.hbm %s2325_s6, %s1420_s10 }
 0x1c7   : > { %1009 = vmatpush2.msra.mxu0 %v888_v10  ;;  %v827_v10 = vld [vmem:[#allocation5 + $0x3d8] sm:$0xff] }
 0x1c8   : > { %1010 = vmatprep.subr.mxu0 %v881_v11  ;;  %v819_v11 = vld [vmem:[#allocation5 + $0x398] sm:$0xff] }
 0x1c9   : > { %1011 = vmatpush2.msra.mxu0 %v880_v12  ;;  %v818_v12 = vld [vmem:[#allocation5 + $0x390] sm:$0xff] }
 0x1ca   : > { %1012 = vmatprep.subr.mxu0 %v873_v13  ;;  %v810_v13 = vld [vmem:[#allocation5 + $0x350] sm:$0xff] }
 0x1cb   : > { %1013 = vmatpush2.msra.mxu0 %v872_v14  ;;  %v795_v14 = vld [vmem:[#allocation5 + $0x2d8] sm:$0xff] }
 0x1cc   : > { %1014 = vmatprep.subr.mxu0 %v865_v15  ;;  %v794_v15 = vld [vmem:[#allocation5 + $0x2d0] sm:$0xff] }
 0x1cd   : > { %1015 = vmatpush2.msra.mxu0 %v864_v16  ;;  %v787_v16 = vld [vmem:[#allocation5 + $0x298] sm:$0xff] }
 0x1ce   : > { %1016 = vmatprep.subr.mxu0 %v857_v19  ;;  %v786_v19 = vld [vmem:[#allocation5 + $0x290] sm:$0xff] }
 0x1cf   : > { %1017 = vmatpush2.msra.mxu0 %v856_v20  ;;  %v779_v20 = vld [vmem:[#allocation5 + $0x258] sm:$0xff] }
 0x1d0   : > { %1018 = vmatprep.subr.mxu0 %v849_v21  ;;  %v778_v21 = vld [vmem:[#allocation5 + $0x250] sm:$0xff] }
 0x218   : > { %v609_v22 = vpop.permute.xlu0 %608  ;;  %v617_v23 = vpop.permute.xlu1 %616 }
 0x21c   : > { %v601_v26 = vpop.permute.xlu0 %600  ;;  %v619_v27 = vpop.permute.xlu1 %618 }
 0x21d   : > { %v620_v2 = vsel %vm471_vm10, %v617_v23, %v619_v27  ;;  %v621_v30 = vsel %vm471_vm10, %v619_v27, %v617_v23  ;;  %vm2414_vm10 = vcmp.lt.s32.totalorder %v1830_v6, 113  ;;  %v811_v6 = vld [vmem:[#allocation5 + $0x358] sm:$0xff]  ;;  %v770_v23 = vld [vmem:[#allocation5 + $0x210] sm:$0xff] }
 0x21e   : > { %v623_v1 = vmul.f32 %v1949_v37, %v621_v30  ;;  %v622_v31 = vmul.f32 %v1953_v38, %v620_v2  ;;  %vm2415_vm1 = vmmov %vm2414_vm10  ;;  %v762_v27 = vld [vmem:[#allocation5 + $0x1d0] sm:$0xff]  ;;  %v755_v2 = vld [vmem:[#allocation5 + $0x198] sm:$0xff] }
 0x21f   : > { %v754_v30 = vld [vmem:[#allocation5 + $0x190] sm:$0xff] }
 0x220   : > { %v593_v32 = vpop.permute.xlu0 %592  ;;  %647 = vmatprep.subr.mxu1 %v623_v1  ;;  %v611_v33 = vpop.permute.xlu1 %610  ;;  %v747_v1 = vld [vmem:[#allocation5 + $0x158] sm:$0xff] }
 0x221   : > { %v612_v36 = vsel %vm462_vm14, %v609_v22, %v611_v33  ;;  %v613_v39 = vsel %vm462_vm14, %v611_v33, %v609_v22  ;;  %648 = vmatpush1.msra.mxu1 %v622_v31  ;;  %v771_v22 = vld [vmem:[#allocation5 + $0x218] sm:$0xff]  ;;  %v746_v31 = vld [vmem:[#allocation5 + $0x150] sm:$0xff] }
 0x222   : > { %v614_v40 = vmul.f32 %v1993_v48, %v612_v36  ;;  %v615_v41 = vmul.f32 %v1974_v43, %v613_v39  ;;  %v738_v33 = vld [vmem:[#allocation5 + $0x110] sm:$0xff]  ;;  %v731_v36 = vld [vmem:[#allocation5 + $0xd8] sm:$0xff] }
 0x223   : > { %v730_v39 = vld [vmem:[#allocation5 + $0xd0] sm:$0xff] }
 0x224   : > { %649 = vmatprep.subr.mxu1 %v615_v41  ;;  %v603_v42 = vpop.permute.xlu1 %602  ;;  %v585_v44 = vpop.permute.xlu0 %584  ;;  %v722_v41 = vld [vmem:[#allocation5 + $0x90] sm:$0xff] }
 0x225   : > { %v604_v37 = vsel %vm2414_vm10, %v601_v26, %v603_v42  ;;  %v605_v38 = vsel %vm2415_vm1, %v603_v42, %v601_v26  ;;  %650 = vmatpush1.msra.mxu1 %v614_v40  ;;  %v763_v26 = vld [vmem:[#allocation5 + $0x1d8] sm:$0xff] }
 0x226   : > { %v606_v24 = vmul.f32 %v2010_v53, %v604_v37  ;;  %v607_v46 = vmul.f32 %v2015_v54, %v605_v38  ;;  %v723_v40 = vld [vmem:[#allocation5 + $0x98] sm:$0xff]  ;;  %v714_v37 = vld [vmem:[#allocation5 + $0x50] sm:$0xff] }
 0x227   : > { %v715_v42 = vld [vmem:[#allocation5 + $0x58] sm:$0xff] }
 0x228   : > { %651 = vmatprep.subr.mxu1 %v607_v46  ;;  %v595_v47 = vpop.permute.xlu1 %594  ;;  %v577_v51 = vpop.permute.xlu0 %576  ;;  %v707_v38 = vld [vmem:[#allocation5 + $0x18] sm:$0xff]  ;;  %v954_v46 = vld [vmem:[#allocation5 + $0x7d0] sm:$0xff] }
 0x229   : > { %v596_v48 = vsel %vm444_vm4, %v593_v32, %v595_v47  ;;  %v597_v43 = vsel %vm444_vm4, %v595_v47, %v593_v32  ;;  %652 = vmatpush1.msra.mxu1 %v606_v24  ;;  %v739_v32 = vld [vmem:[#allocation5 + $0x118] sm:$0xff] }
 0x22a   : > { %v598_v49 = vmul.f32 %v2055_v7, %v596_v48  ;;  %v599_v50 = vmul.f32 %v2060_v8, %v597_v43  ;;  %v955_v24 = vld [vmem:[#allocation5 + $0x7d8] sm:$0xff]  ;;  %v946_v48 = vld [vmem:[#allocation5 + $0x790] sm:$0xff] }
 0x22b   : > { %v947_v47 = vld [vmem:[#allocation5 + $0x798] sm:$0xff] }
 0x22c   : > { %653 = vmatprep.subr.mxu1 %v599_v50  ;;  %v587_v52 = vpop.permute.xlu1 %586  ;;  %v569_v57 = vpop.permute.xlu0 %568  ;;  %v939_v43 = vld [vmem:[#allocation5 + $0x758] sm:$0xff] }
 0x22d   : > { %v588_v53 = vsel %vm435_vm7, %v585_v44, %v587_v52  ;;  %v589_v54 = vsel %vm435_vm7, %v587_v52, %v585_v44  ;;  %654 = vmatpush1.msra.mxu1 %v598_v49  ;;  %v706_v44 = vld [vmem:[#allocation5 + $0x10] sm:$0xff]  ;;  %v931_v50 = vld [vmem:[#allocation5 + $0x718] sm:$0xff] }
 0x22e   : > { %v590_v0 = vmul.f32 %v2092_v17, %v589_v54  ;;  %v591_v55 = vmul.f32 %v2095_v18, %v588_v53  ;;  %655 = vmatprep.subr.mxu1 %v2188_v60  ;;  %v938_v49 = vld [vmem:[#allocation5 + $0x750] sm:$0xff]  ;;  %v923_v52 = vld [vmem:[#allocation5 + $0x6d8] sm:$0xff] }
 0x22f   : > { %656 = vmatpush1.msra.mxu1 %v2182_v58  ;;  %v922_v53 = vld [vmem:[#allocation5 + $0x6d0] sm:$0xff]  ;;  %v915_v54 = vld [vmem:[#allocation5 + $0x698] sm:$0xff] }
 0x230   : > { %657 = vmatprep.subr.mxu1 %v591_v55  ;;  %v579_v7 = vpop.permute.xlu1 %578  ;;  %v561_v63 = vpop.permute.xlu0 %560  ;;  %v907_v55 = vld [vmem:[#allocation5 + $0x658] sm:$0xff] }
 0x231   : > { %v580_v8 = vsel %vm426_vm3, %v577_v51, %v579_v7  ;;  %v581_v56 = vsel %vm426_vm3, %v579_v7, %v577_v51  ;;  %658 = vmatpush1.msra.mxu1 %v590_v0  ;;  %v930_v51 = vld [vmem:[#allocation5 + $0x710] sm:$0xff] }
 0x232   : > { %v582_v59 = vmul.f32 %v2123_v28, %v581_v56  ;;  %v583_v17 = vmul.f32 %v2128_v29, %v580_v8  ;;  %v914_v0 = vld [vmem:[#allocation5 + $0x690] sm:$0xff]  ;;  %v899_v8 = vld [vmem:[#allocation5 + $0x618] sm:$0xff] }
 0x233   : > { %v906_v7 = vld [vmem:[#allocation5 + $0x650] sm:$0xff] }
 0x234   : > { %659 = vmatprep.subr.mxu1 %v583_v17  ;;  %v571_v18 = vpop.permute.xlu1 %570  ;;  %v898_v56 = vld [vmem:[#allocation5 + $0x610] sm:$0xff]  ;;  %v883_v17 = vld [vmem:[#allocation5 + $0x598] sm:$0xff] }
 0x235   : > { %v572_v60 = vsel %vm417_vm5, %v569_v57, %v571_v18  ;;  %v573_v58 = vsel %vm417_vm5, %v571_v18, %v569_v57  ;;  %660 = vmatpush1.msra.mxu1 %v582_v59  ;;  %v891_v57 = vld [vmem:[#allocation5 + $0x5d8] sm:$0xff]  ;;  %v890_v59 = vld [vmem:[#allocation5 + $0x5d0] sm:$0xff] }
 0x236   : > { %v574_v61 = vmul.f32 %v2150_v34, %v573_v58  ;;  %v575_v62 = vmul.f32 %v2153_v35, %v572_v60  ;;  %v559_v34 = vld [vmem:[%s2322_s3] sm:$0xff]  ;;  %v826_v35 = vld [vmem:[#allocation5 + $0x3d0] sm:$0xff]  ;;  %v875_v60 = vld [vmem:[#allocation5 + $0x558] sm:$0xff] }
 0x237   : > { %v882_v18 = vld [vmem:[#allocation5 + $0x590] sm:$0xff] }
 0x238   : > { %661 = vmatprep.subr.mxu1 %v575_v62  ;;  %v563_v3 = vpop.permute.xlu1 %562  ;;  %v874_v58 = vld [vmem:[#allocation5 + $0x550] sm:$0xff] }
 0x239   : > { %v564_v28 = vsel %vm408_vm13, %v561_v63, %v563_v3  ;;  %v565_v29 = vsel %vm408_vm13, %v563_v3, %v561_v63  ;;  %662 = vmatpush1.msra.mxu1 %v574_v61  ;;  %v867_v61 = vld [vmem:[#allocation5 + $0x518] sm:$0xff]  ;;  %v866_v62 = vld [vmem:[#allocation5 + $0x510] sm:$0xff] }
 0x23a   : > { %v566_v4 = vmul.f32 %v2167_v25, %v565_v29  ;;  %v567_v9 = vmul.f32 %v2170_v45, %v564_v28  ;;  %v803_v25 = vld [vmem:[#allocation5 + $0x318] sm:$0xff]  ;;  %v802_v45 = vld [vmem:[#allocation5 + $0x310] sm:$0xff]  ;;  %v848_v29 = vld [vmem:[#allocation5 + $0x480] sm:$0xff] }
 0x23b   : > { %v859_v63 = vld [vmem:[#allocation5 + $0x4d8] sm:$0xff]  ;;  %v858_v3 = vld [vmem:[#allocation5 + $0x4d0] sm:$0xff]  ;;  %1019 = vmatpush2.msra.mxu0 %v848_v29  ;;  %v733_v29 = vld [vmem:[#allocation5 + $0xe8] sm:$0xff] }
 0x23c   : > { %663 = vmatprep.subr.mxu1 %v567_v9  ;;  %v851_v28 = vld [vmem:[#allocation5 + $0x498] sm:$0xff]  ;;  %v841_v9 = vld [vmem:[#allocation5 + $0x448] sm:$0xff] }
 0x23d   : > { %664 = vmatpush1.msra.mxu1 %v566_v4  ;;  %v850_v4 = vld [vmem:[#allocation5 + $0x490] sm:$0xff]  ;;  %1020 = vmatprep.subr.mxu0 %v841_v9  ;;  %v732_v9 = vld [vmem:[#allocation5 + $0xe0] sm:$0xff] }
 0x23e   : > { %1413 = vmatmul.mubr.msk.f32.vlgmr.msra.gmra.mxu1 %vm482_vm9, %v559_v34  ;;  %1031 = vmatprep.subr.mxu1 %v827_v10  ;;  %v843_v34 = vld [vmem:[#allocation5 + $0x458] sm:$0xff]  ;;  %v840_v10 = vld [vmem:[#allocation5 + $0x440] sm:$0xff] }
 0x23f   : > { %1032 = vmatpush1.msra.mxu1 %v826_v35  ;;  %v842_v35 = vld [vmem:[#allocation5 + $0x450] sm:$0xff]  ;;  %1021 = vmatpush2.msra.mxu0 %v840_v10  ;;  %v725_v10 = vld [vmem:[#allocation5 + $0xa8] sm:$0xff] }
 0x240   : > { %1033 = vmatprep.subr.mxu1 %v819_v11  ;;  %v833_v11 = vld [vmem:[#allocation5 + $0x408] sm:$0xff] }
 0x241   : > { %1034 = vmatpush1.msra.mxu1 %v818_v12  ;;  %v835_v12 = vld [vmem:[#allocation5 + $0x418] sm:$0xff]  ;;  %1022 = vmatprep.subr.mxu0 %v833_v11  ;;  %v724_v11 = vld [vmem:[#allocation5 + $0xa0] sm:$0xff] }
 0x242   : > { %1035 = vmatprep.subr.mxu1 %v811_v6  ;;  %v832_v6 = vld [vmem:[#allocation5 + $0x400] sm:$0xff] }
 0x243   : > { %1036 = vmatpush1.msra.mxu1 %v810_v13  ;;  %v834_v13 = vld [vmem:[#allocation5 + $0x410] sm:$0xff]  ;;  %1023 = vmatpush2.msra.mxu0 %v832_v6  ;;  %v717_v6 = vld [vmem:[#allocation5 + $0x68] sm:$0xff] }
 0x244   : > { %1037 = vmatprep.subr.mxu1 %v803_v25  ;;  %v829_v25 = vld [vmem:[#allocation5 + $0x3e8] sm:$0xff] }
 0x245   : > { %1038 = vmatpush1.msra.mxu1 %v802_v45  ;;  %v831_v45 = vld [vmem:[#allocation5 + $0x3f8] sm:$0xff]  ;;  %1102 = vmatprep.subr.mxu0 %v829_v25  ;;  %v716_v25 = vld [vmem:[#allocation5 + $0x60] sm:$0xff] }
 0x246   : > { %1039 = vmatprep.subr.mxu1 %v795_v14 }
 0x247   : > { %1040 = vmatpush1.msra.mxu1 %v794_v15  ;;  %v628_v15 = vpop.permute.xlu0 %627 }
 0x248   : > { %1041 = vmatprep.subr.mxu1 %v787_v16 }
 0x249   : > { %1042 = vmatpush1.msra.mxu1 %v786_v19 }
 0x24a   : > { %1043 = vmatprep.subr.mxu1 %v779_v20 }
 0x24b   : > { %1044 = vmatpush1.msra.mxu1 %v778_v21  ;;  %v828_v21 = vld [vmem:[#allocation5 + $0x3e0] sm:$0xff] }
 0x24c   : > { %1045 = vmatprep.subr.mxu1 %v771_v22  ;;  %v830_v22 = vld [vmem:[#allocation5 + $0x3f0] sm:$0xff] }
 0x24d   : > { %1046 = vmatpush1.msra.mxu1 %v770_v23  ;;  %v821_v23 = vld [vmem:[#allocation5 + $0x3a8] sm:$0xff] }
 0x24e   : > { %1047 = vmatprep.subr.mxu1 %v763_v26  ;;  %v823_v26 = vld [vmem:[#allocation5 + $0x3b8] sm:$0xff] }
 0x24f   : > { %1048 = vmatpush1.msra.mxu1 %v762_v27  ;;  %v820_v27 = vld [vmem:[#allocation5 + $0x3a0] sm:$0xff] }
 0x250   : > { %1049 = vmatprep.subr.mxu1 %v755_v2  ;;  %v822_v2 = vld [vmem:[#allocation5 + $0x3b0] sm:$0xff] }
 0x251   : > { %1050 = vmatpush1.msra.mxu1 %v754_v30  ;;  %v813_v30 = vld [vmem:[#allocation5 + $0x368] sm:$0xff] }
 0x252   : > { %1051 = vmatprep.subr.mxu1 %v747_v1  ;;  %v815_v1 = vld [vmem:[#allocation5 + $0x378] sm:$0xff] }
 0x253   : > { %1052 = vmatpush1.msra.mxu1 %v746_v31  ;;  %v812_v31 = vld [vmem:[#allocation5 + $0x360] sm:$0xff] }
 0x254   : > { %1053 = vmatprep.subr.mxu1 %v739_v32  ;;  %v814_v32 = vld [vmem:[#allocation5 + $0x370] sm:$0xff] }
 0x255   : > { %1054 = vmatpush1.msra.mxu1 %v738_v33  ;;  %v805_v33 = vld [vmem:[#allocation5 + $0x328] sm:$0xff] }
 0x256   : > { %1055 = vmatprep.subr.mxu1 %v731_v36  ;;  %v807_v36 = vld [vmem:[#allocation5 + $0x338] sm:$0xff] }
 0x257   : > { %1056 = vmatpush1.msra.mxu1 %v730_v39  ;;  %v804_v39 = vld [vmem:[#allocation5 + $0x320] sm:$0xff] }
 0x258   : > { %1057 = vmatprep.subr.mxu1 %v723_v40  ;;  %v806_v40 = vld [vmem:[#allocation5 + $0x330] sm:$0xff] }
 0x259   : > { %1058 = vmatpush1.msra.mxu1 %v722_v41  ;;  %v797_v41 = vld [vmem:[#allocation5 + $0x2e8] sm:$0xff] }
 0x25a   : > { %1059 = vmatprep.subr.mxu1 %v715_v42  ;;  %v799_v42 = vld [vmem:[#allocation5 + $0x2f8] sm:$0xff] }
 0x25b   : > { %1060 = vmatpush1.msra.mxu1 %v714_v37  ;;  %v796_v37 = vld [vmem:[#allocation5 + $0x2e0] sm:$0xff] }
 0x25c   : > { %1061 = vmatprep.subr.mxu1 %v707_v38  ;;  %v798_v38 = vld [vmem:[#allocation5 + $0x2f0] sm:$0xff] }
 0x25d   : > { %1062 = vmatpush1.msra.mxu1 %v706_v44  ;;  %v789_v44 = vld [vmem:[#allocation5 + $0x2a8] sm:$0xff] }
 0x25e   : > { %1063 = vmatprep.subr.mxu1 %v955_v24  ;;  %v791_v24 = vld [vmem:[#allocation5 + $0x2b8] sm:$0xff] }
 0x25f   : > { %1064 = vmatpush2.msra.mxu1 %v954_v46  ;;  %v788_v46 = vld [vmem:[#allocation5 + $0x2a0] sm:$0xff] }
 0x260   : > { %1065 = vmatprep.subr.mxu1 %v947_v47  ;;  %v790_v47 = vld [vmem:[#allocation5 + $0x2b0] sm:$0xff] }
 0x261   : > { %1066 = vmatpush2.msra.mxu1 %v946_v48  ;;  %v781_v48 = vld [vmem:[#allocation5 + $0x268] sm:$0xff] }
 0x262   : > { %1067 = vmatprep.subr.mxu1 %v939_v43  ;;  %v783_v43 = vld [vmem:[#allocation5 + $0x278] sm:$0xff] }
 0x263   : > { %1068 = vmatpush2.msra.mxu1 %v938_v49  ;;  %v780_v49 = vld [vmem:[#allocation5 + $0x260] sm:$0xff] }
 0x264   : > { %1069 = vmatprep.subr.mxu1 %v931_v50  ;;  %v782_v50 = vld [vmem:[#allocation5 + $0x270] sm:$0xff] }
 0x265   : > { %1070 = vmatpush2.msra.mxu1 %v930_v51  ;;  %v773_v51 = vld [vmem:[#allocation5 + $0x228] sm:$0xff] }
 0x266   : > { %1071 = vmatprep.subr.mxu1 %v923_v52  ;;  %v775_v52 = vld [vmem:[#allocation5 + $0x238] sm:$0xff] }
 0x267   : > { %1072 = vmatpush2.msra.mxu1 %v922_v53  ;;  %v772_v53 = vld [vmem:[#allocation5 + $0x220] sm:$0xff] }
 0x268   : > { %1073 = vmatprep.subr.mxu1 %v915_v54  ;;  %v774_v54 = vld [vmem:[#allocation5 + $0x230] sm:$0xff] }
 0x269   : > { %1074 = vmatpush2.msra.mxu1 %v914_v0  ;;  %v765_v0 = vld [vmem:[#allocation5 + $0x1e8] sm:$0xff] }
 0x26a   : > { %1075 = vmatprep.subr.mxu1 %v907_v55  ;;  %v767_v55 = vld [vmem:[#allocation5 + $0x1f8] sm:$0xff] }
 0x26b   : > { %1076 = vmatpush2.msra.mxu1 %v906_v7  ;;  %v764_v7 = vld [vmem:[#allocation5 + $0x1e0] sm:$0xff] }
 0x26c   : > { %1077 = vmatprep.subr.mxu1 %v899_v8  ;;  %v766_v8 = vld [vmem:[#allocation5 + $0x1f0] sm:$0xff] }
 0x26d   : > { %1078 = vmatpush2.msra.mxu1 %v898_v56  ;;  %v757_v56 = vld [vmem:[#allocation5 + $0x1a8] sm:$0xff] }
 0x26e   : > { %1079 = vmatprep.subr.mxu1 %v891_v57  ;;  %v759_v57 = vld [vmem:[#allocation5 + $0x1b8] sm:$0xff] }
 0x26f   : > { %1080 = vmatpush2.msra.mxu1 %v890_v59  ;;  %v756_v59 = vld [vmem:[#allocation5 + $0x1a0] sm:$0xff] }
 0x270   : > { %1081 = vmatprep.subr.mxu1 %v883_v17  ;;  %v758_v17 = vld [vmem:[#allocation5 + $0x1b0] sm:$0xff] }
 0x271   : > { %1082 = vmatpush2.msra.mxu1 %v882_v18  ;;  %v749_v18 = vld [vmem:[#allocation5 + $0x168] sm:$0xff] }
 0x272   : > { %1083 = vmatprep.subr.mxu1 %v875_v60  ;;  %v751_v60 = vld [vmem:[#allocation5 + $0x178] sm:$0xff] }
 0x273   : > { %1084 = vmatpush2.msra.mxu1 %v874_v58  ;;  %v748_v58 = vld [vmem:[#allocation5 + $0x160] sm:$0xff] }
 0x274   : > { %1085 = vmatprep.subr.mxu1 %v867_v61  ;;  %v750_v61 = vld [vmem:[#allocation5 + $0x170] sm:$0xff] }
 0x275   : > { %1086 = vmatpush2.msra.mxu1 %v866_v62  ;;  %v741_v62 = vld [vmem:[#allocation5 + $0x128] sm:$0xff] }
 0x276   : > { %1087 = vmatprep.subr.mxu1 %v859_v63  ;;  %v743_v63 = vld [vmem:[#allocation5 + $0x138] sm:$0xff] }
 0x277   : > { %1088 = vmatpush2.msra.mxu1 %v858_v3  ;;  %v740_v3 = vld [vmem:[#allocation5 + $0x120] sm:$0xff] }
 0x278   : > { %1089 = vmatprep.subr.mxu1 %v851_v28  ;;  %v742_v28 = vld [vmem:[#allocation5 + $0x130] sm:$0xff] }
 0x279   : > { %1090 = vmatpush2.msra.mxu1 %v850_v4  ;;  %v735_v4 = vld [vmem:[#allocation5 + $0xf8] sm:$0xff] }
 0x27a   : > { %1091 = vmatprep.subr.mxu1 %v843_v34  ;;  %v734_v34 = vld [vmem:[#allocation5 + $0xf0] sm:$0xff] }
 0x27b   : > { %1092 = vmatpush2.msra.mxu1 %v842_v35  ;;  %v727_v35 = vld [vmem:[#allocation5 + $0xb8] sm:$0xff] }
 0x27c   : > { %1093 = vmatprep.subr.mxu1 %v835_v12  ;;  %v726_v12 = vld [vmem:[#allocation5 + $0xb0] sm:$0xff] }
 0x27d   : > { %1094 = vmatpush2.msra.mxu1 %v834_v13  ;;  %v719_v13 = vld [vmem:[#allocation5 + $0x78] sm:$0xff] }
 0x27e   : > { %1173 = vmatprep.subr.mxu1 %v831_v45  ;;  %v718_v45 = vld [vmem:[#allocation5 + $0x70] sm:$0xff] }
 0x2fe   : > { %v699_v14 = vpop.f32.mrf.mxu1 }
 0x2ff   : > { %v2275_v20 = vadd.f32 %v699_v14, %v628_v15  ;;  %v709_v14 = vld [vmem:[#allocation5 + $0x28] sm:$0xff] }
 0x300   : > { %v701_v16 = vpop.f32.mrf.mxu1 }
 0x301   : > { %v702_v19 = vadd.f32 %v701_v16, %v628_v15  ;;  %v711_v15 = vld [vmem:[#allocation5 + $0x38] sm:$0xff]  ;;  %v708_v16 = vld [vmem:[#allocation5 + $0x20] sm:$0xff] }
 0x303   : > { %1024 = vmatprep.mubr.f32.mxu0 %v702_v19  ;;  %1095 = vmatprep.mubr.f32.mxu1 %v702_v19 }
 0x304   : > { %1025 = vmatmul.mubr.f32.vlgmr.msra.gmra.mxu0 %v2275_v20  ;;  %1096 = vmatmul.mubr.f32.vlgmr.msra.gmra.mxu1 %v2275_v20 }
 0x305   : > { %1103 = vmatpush1.msra.mxu0 %v828_v21  ;;  %1174 = vmatpush1.msra.mxu1 %v830_v22  ;;  %v957_v21 = vld [vmem:[#allocation5 + $0x7e8] sm:$0xff]  ;;  %v959_v22 = vld [vmem:[#allocation5 + $0x7f8] sm:$0xff] }
 0x306   : > { %1104 = vmatprep.subr.mxu0 %v821_v23  ;;  %1166 = vmatprep.mubr.f32.mxu0 %v702_v19  ;;  %v956_v23 = vld [vmem:[#allocation5 + $0x7e0] sm:$0xff] }
 0x307   : > { %1175 = vmatprep.subr.mxu1 %v823_v26  ;;  %1237 = vmatprep.mubr.f32.mxu1 %v702_v19  ;;  %v710_v19 = vld [vmem:[#allocation5 + $0x30] sm:$0xff] }
 0x308   : > { %1105 = vmatpush1.msra.mxu0 %v820_v27  ;;  %1176 = vmatpush1.msra.mxu1 %v822_v2  ;;  %v958_v26 = vld [vmem:[#allocation5 + $0x7f0] sm:$0xff]  ;;  %v949_v27 = vld [vmem:[#allocation5 + $0x7a8] sm:$0xff]  ;;  %v951_v2 = vld [vmem:[#allocation5 + $0x7b8] sm:$0xff] }
 0x309   : > { %1106 = vmatprep.subr.mxu0 %v813_v30  ;;  %1177 = vmatprep.subr.mxu1 %v815_v1  ;;  %v948_v30 = vld [vmem:[#allocation5 + $0x7a0] sm:$0xff]  ;;  %v950_v1 = vld [vmem:[#allocation5 + $0x7b0] sm:$0xff] }
 0x30a   : > { %1107 = vmatpush1.msra.mxu0 %v812_v31  ;;  %1178 = vmatpush1.msra.mxu1 %v814_v32  ;;  %v941_v31 = vld [vmem:[#allocation5 + $0x768] sm:$0xff]  ;;  %v943_v32 = vld [vmem:[#allocation5 + $0x778] sm:$0xff] }
 0x30b   : > { %1108 = vmatprep.subr.mxu0 %v805_v33  ;;  %1179 = vmatprep.subr.mxu1 %v807_v36  ;;  %v940_v33 = vld [vmem:[#allocation5 + $0x760] sm:$0xff]  ;;  %v942_v36 = vld [vmem:[#allocation5 + $0x770] sm:$0xff] }
 0x30c   : > { %1109 = vmatpush1.msra.mxu0 %v804_v39  ;;  %1180 = vmatpush1.msra.mxu1 %v806_v40  ;;  %v933_v39 = vld [vmem:[#allocation5 + $0x728] sm:$0xff]  ;;  %v935_v40 = vld [vmem:[#allocation5 + $0x738] sm:$0xff] }
 0x30d   : > { %1110 = vmatprep.subr.mxu0 %v797_v41  ;;  %1181 = vmatprep.subr.mxu1 %v799_v42  ;;  %v932_v41 = vld [vmem:[#allocation5 + $0x720] sm:$0xff]  ;;  %v934_v42 = vld [vmem:[#allocation5 + $0x730] sm:$0xff] }
 0x30e   : > { %1111 = vmatpush1.msra.mxu0 %v796_v37  ;;  %1182 = vmatpush1.msra.mxu1 %v798_v38  ;;  %v925_v37 = vld [vmem:[#allocation5 + $0x6e8] sm:$0xff]  ;;  %v927_v38 = vld [vmem:[#allocation5 + $0x6f8] sm:$0xff] }
 0x30f   : > { %1112 = vmatprep.subr.mxu0 %v789_v44  ;;  %1183 = vmatprep.subr.mxu1 %v791_v24  ;;  %v924_v44 = vld [vmem:[#allocation5 + $0x6e0] sm:$0xff]  ;;  %v926_v24 = vld [vmem:[#allocation5 + $0x6f0] sm:$0xff] }
 0x310   : > { %1113 = vmatpush1.msra.mxu0 %v788_v46  ;;  %1184 = vmatpush1.msra.mxu1 %v790_v47  ;;  %v917_v46 = vld [vmem:[#allocation5 + $0x6a8] sm:$0xff]  ;;  %v919_v47 = vld [vmem:[#allocation5 + $0x6b8] sm:$0xff] }
 0x311   : > { %1114 = vmatprep.subr.mxu0 %v781_v48  ;;  %1185 = vmatprep.subr.mxu1 %v783_v43  ;;  %v916_v48 = vld [vmem:[#allocation5 + $0x6a0] sm:$0xff]  ;;  %v918_v43 = vld [vmem:[#allocation5 + $0x6b0] sm:$0xff] }
 0x312   : > { %1115 = vmatpush1.msra.mxu0 %v780_v49  ;;  %1186 = vmatpush1.msra.mxu1 %v782_v50  ;;  %v909_v49 = vld [vmem:[#allocation5 + $0x668] sm:$0xff]  ;;  %v911_v50 = vld [vmem:[#allocation5 + $0x678] sm:$0xff] }
 0x313   : > { %1116 = vmatprep.subr.mxu0 %v773_v51  ;;  %1187 = vmatprep.subr.mxu1 %v775_v52  ;;  %v908_v51 = vld [vmem:[#allocation5 + $0x660] sm:$0xff]  ;;  %v910_v52 = vld [vmem:[#allocation5 + $0x670] sm:$0xff] }
 0x314   : > { %1117 = vmatpush1.msra.mxu0 %v772_v53  ;;  %1188 = vmatpush1.msra.mxu1 %v774_v54  ;;  %v901_v53 = vld [vmem:[#allocation5 + $0x628] sm:$0xff]  ;;  %v903_v54 = vld [vmem:[#allocation5 + $0x638] sm:$0xff] }
 0x315   : > { %1118 = vmatprep.subr.mxu0 %v765_v0  ;;  %1189 = vmatprep.subr.mxu1 %v767_v55  ;;  %v900_v0 = vld [vmem:[#allocation5 + $0x620] sm:$0xff]  ;;  %v902_v55 = vld [vmem:[#allocation5 + $0x630] sm:$0xff] }
 0x316   : > { %1119 = vmatpush1.msra.mxu0 %v764_v7  ;;  %1190 = vmatpush1.msra.mxu1 %v766_v8  ;;  %v893_v7 = vld [vmem:[#allocation5 + $0x5e8] sm:$0xff]  ;;  %v895_v8 = vld [vmem:[#allocation5 + $0x5f8] sm:$0xff] }
 0x317   : > { %1120 = vmatprep.subr.mxu0 %v757_v56  ;;  %1191 = vmatprep.subr.mxu1 %v759_v57  ;;  %v892_v56 = vld [vmem:[#allocation5 + $0x5e0] sm:$0xff]  ;;  %v894_v57 = vld [vmem:[#allocation5 + $0x5f0] sm:$0xff] }
 0x318   : > { %1121 = vmatpush1.msra.mxu0 %v756_v59  ;;  %1192 = vmatpush1.msra.mxu1 %v758_v17  ;;  %v885_v59 = vld [vmem:[#allocation5 + $0x5a8] sm:$0xff]  ;;  %v887_v17 = vld [vmem:[#allocation5 + $0x5b8] sm:$0xff] }
 0x319   : > { %1122 = vmatprep.subr.mxu0 %v749_v18  ;;  %1193 = vmatprep.subr.mxu1 %v751_v60  ;;  %v884_v18 = vld [vmem:[#allocation5 + $0x5a0] sm:$0xff]  ;;  %v886_v60 = vld [vmem:[#allocation5 + $0x5b0] sm:$0xff] }
 0x31a   : > { %1123 = vmatpush1.msra.mxu0 %v748_v58  ;;  %1194 = vmatpush1.msra.mxu1 %v750_v61  ;;  %v877_v58 = vld [vmem:[#allocation5 + $0x568] sm:$0xff]  ;;  %v879_v61 = vld [vmem:[#allocation5 + $0x578] sm:$0xff] }
 0x31b   : > { %1124 = vmatprep.subr.mxu0 %v741_v62  ;;  %1195 = vmatprep.subr.mxu1 %v743_v63  ;;  %v876_v62 = vld [vmem:[#allocation5 + $0x560] sm:$0xff]  ;;  %v878_v63 = vld [vmem:[#allocation5 + $0x570] sm:$0xff] }
 0x31c   : > { %1125 = vmatpush1.msra.mxu0 %v740_v3  ;;  %1196 = vmatpush1.msra.mxu1 %v742_v28  ;;  %v869_v3 = vld [vmem:[#allocation5 + $0x528] sm:$0xff]  ;;  %v871_v28 = vld [vmem:[#allocation5 + $0x538] sm:$0xff] }
 0x31d   : > { %1126 = vmatprep.subr.mxu0 %v733_v29  ;;  %1197 = vmatprep.subr.mxu1 %v735_v4  ;;  %v868_v29 = vld [vmem:[#allocation5 + $0x520] sm:$0xff]  ;;  %v870_v4 = vld [vmem:[#allocation5 + $0x530] sm:$0xff] }
 0x31e   : > { %1127 = vmatpush1.msra.mxu0 %v732_v9  ;;  %1198 = vmatpush1.msra.mxu1 %v734_v34  ;;  %v861_v9 = vld [vmem:[#allocation5 + $0x4e8] sm:$0xff]  ;;  %v863_v34 = vld [vmem:[#allocation5 + $0x4f8] sm:$0xff] }
 0x31f   : > { %1128 = vmatprep.subr.mxu0 %v725_v10  ;;  %1199 = vmatprep.subr.mxu1 %v727_v35  ;;  %v860_v10 = vld [vmem:[#allocation5 + $0x4e0] sm:$0xff]  ;;  %v862_v35 = vld [vmem:[#allocation5 + $0x4f0] sm:$0xff] }
 0x320   : > { %1129 = vmatpush1.msra.mxu0 %v724_v11  ;;  %1200 = vmatpush1.msra.mxu1 %v726_v12  ;;  %v853_v11 = vld [vmem:[#allocation5 + $0x4a8] sm:$0xff]  ;;  %v855_v12 = vld [vmem:[#allocation5 + $0x4b8] sm:$0xff] }
 0x321   : > { %1130 = vmatprep.subr.mxu0 %v717_v6  ;;  %1201 = vmatprep.subr.mxu1 %v719_v13  ;;  %v852_v6 = vld [vmem:[#allocation5 + $0x4a0] sm:$0xff]  ;;  %v854_v13 = vld [vmem:[#allocation5 + $0x4b0] sm:$0xff] }
 0x322   : > { %1131 = vmatpush1.msra.mxu0 %v716_v25  ;;  %1202 = vmatpush1.msra.mxu1 %v718_v45  ;;  %v845_v25 = vld [vmem:[#allocation5 + $0x468] sm:$0xff]  ;;  %v847_v45 = vld [vmem:[#allocation5 + $0x478] sm:$0xff] }
 0x323   : > { %1132 = vmatprep.subr.mxu0 %v709_v14  ;;  %1203 = vmatprep.subr.mxu1 %v711_v15  ;;  %v844_v14 = vld [vmem:[#allocation5 + $0x460] sm:$0xff]  ;;  %v846_v15 = vld [vmem:[#allocation5 + $0x470] sm:$0xff] }
 0x324   : > { %1133 = vmatpush1.msra.mxu0 %v708_v16  ;;  %1204 = vmatpush1.msra.mxu1 %v710_v19  ;;  %v837_v16 = vld [vmem:[#allocation5 + $0x428] sm:$0xff]  ;;  %v839_v19 = vld [vmem:[#allocation5 + $0x438] sm:$0xff] }
 0x325   : > { %1134 = vmatprep.subr.mxu0 %v957_v21  ;;  %1205 = vmatprep.subr.mxu1 %v959_v22  ;;  %v836_v21 = vld [vmem:[#allocation5 + $0x420] sm:$0xff]  ;;  %v838_v22 = vld [vmem:[#allocation5 + $0x430] sm:$0xff] }
 0x326   : > { %1135 = vmatpush2.msra.mxu0 %v956_v23  ;;  %1206 = vmatpush2.msra.mxu1 %v958_v26  ;;  %v1630_v23 = vmov 1983009808  }
 0x327   : > { %1136 = vmatprep.subr.mxu0 %v949_v27  ;;  %1207 = vmatprep.subr.mxu1 %v951_v2  ;;  %v1255_v26 = vunpack.c.l.s4 %v1630_v23  ;;  %v1258_v2 = vshrl.u32 %v284_v5, 7 }
 0x328   : > { %1137 = vmatpush2.msra.mxu0 %v948_v30  ;;  %1208 = vmatpush2.msra.mxu1 %v950_v1 }
 0x329   : > { %1138 = vmatprep.subr.mxu0 %v941_v31  ;;  %1209 = vmatprep.subr.mxu1 %v943_v32  ;;  %v1256_v27 = vunpack.c.0.s8 %v1255_v26 }
 0x32a   : > { %1139 = vmatpush2.msra.mxu0 %v940_v33  ;;  %1210 = vmatpush2.msra.mxu1 %v942_v36 }
 0x32b   : > { %1140 = vmatprep.subr.mxu0 %v933_v39  ;;  %1211 = vmatprep.subr.mxu1 %v935_v40  ;;  %v1259_v31 = vsub.s32 %v1256_v27, %v1258_v2 }
 0x32c   : > { %1141 = vmatpush2.msra.mxu0 %v932_v41  ;;  %1212 = vmatpush2.msra.mxu1 %v934_v42 }
 0x32d   : > { %1142 = vmatprep.subr.mxu0 %v925_v37  ;;  %1213 = vmatprep.subr.mxu1 %v927_v38 }
 0x32e   : > { %1143 = vmatpush2.msra.mxu0 %v924_v44  ;;  %1214 = vmatpush2.msra.mxu1 %v926_v24 }
 0x32f   : > { %1144 = vmatprep.subr.mxu0 %v917_v46  ;;  %1215 = vmatprep.subr.mxu1 %v919_v47 }
 0x330   : > { %1145 = vmatpush2.msra.mxu0 %v916_v48  ;;  %1216 = vmatpush2.msra.mxu1 %v918_v43 }
 0x331   : > { %1146 = vmatprep.subr.mxu0 %v909_v49  ;;  %1217 = vmatprep.subr.mxu1 %v911_v50 }
 0x332   : > { %1147 = vmatpush2.msra.mxu0 %v908_v51  ;;  %1218 = vmatpush2.msra.mxu1 %v910_v52 }
 0x333   : > { %1148 = vmatprep.subr.mxu0 %v901_v53  ;;  %1219 = vmatprep.subr.mxu1 %v903_v54 }
 0x334   : > { %1149 = vmatpush2.msra.mxu0 %v900_v0  ;;  %1220 = vmatpush2.msra.mxu1 %v902_v55 }
 0x335   : > { %1150 = vmatprep.subr.mxu0 %v893_v7  ;;  %1221 = vmatprep.subr.mxu1 %v895_v8 }
 0x336   : > { %1151 = vmatpush2.msra.mxu0 %v892_v56  ;;  %1222 = vmatpush2.msra.mxu1 %v894_v57 }
 0x337   : > { %1152 = vmatprep.subr.mxu0 %v885_v59  ;;  %1223 = vmatprep.subr.mxu1 %v887_v17 }
 0x338   : > { %1153 = vmatpush2.msra.mxu0 %v884_v18  ;;  %1224 = vmatpush2.msra.mxu1 %v886_v60 }
 0x339   : > { %1154 = vmatprep.subr.mxu0 %v877_v58  ;;  %1225 = vmatprep.subr.mxu1 %v879_v61 }
 0x33a   : > { %1155 = vmatpush2.msra.mxu0 %v876_v62  ;;  %1226 = vmatpush2.msra.mxu1 %v878_v63 }
 0x33b   : > { %1156 = vmatprep.subr.mxu0 %v869_v3  ;;  %1227 = vmatprep.subr.mxu1 %v871_v28 }
 0x33c   : > { %1157 = vmatpush2.msra.mxu0 %v868_v29  ;;  %1228 = vmatpush2.msra.mxu1 %v870_v4 }
 0x33d   : > { %1158 = vmatprep.subr.mxu0 %v861_v9  ;;  %1229 = vmatprep.subr.mxu1 %v863_v34 }
 0x33e   : > { %1159 = vmatpush2.msra.mxu0 %v860_v10  ;;  %1230 = vmatpush2.msra.mxu1 %v862_v35 }
 0x33f   : > { %1160 = vmatprep.subr.mxu0 %v853_v11  ;;  %1231 = vmatprep.subr.mxu1 %v855_v12 }
 0x340   : > { %1161 = vmatpush2.msra.mxu0 %v852_v6  ;;  %1232 = vmatpush2.msra.mxu1 %v854_v13 }
 0x341   : > { %1162 = vmatprep.subr.mxu0 %v845_v25  ;;  %1233 = vmatprep.subr.mxu1 %v847_v45 }
 0x342   : > { %1163 = vmatpush2.msra.mxu0 %v844_v14  ;;  %1234 = vmatpush2.msra.mxu1 %v846_v15 }
 0x343   : > { %1164 = vmatprep.subr.mxu0 %v837_v16  ;;  %1235 = vmatprep.subr.mxu1 %v839_v19 }
 0x344   : > { %1165 = vmatpush2.msra.mxu0 %v836_v21  ;;  %1236 = vmatpush2.msra.mxu1 %v838_v22 }
 0x345   : > { %1167 = vmatmul.mubr.f32.vlgmr.msra.gmra.mxu0 %v2275_v20  ;;  %1238 = vmatmul.mubr.f32.vlgmr.msra.gmra.mxu1 %v2275_v20 }
 0x3c4   : > { %v1026_v30 = vpop.f32.mrf.mxu0  ;;  %v1097_v1 = vpop.f32.mrf.mxu1 }
 0x3c6   : > { %v1028_v32 = vpop.f32.mrf.mxu0  ;;  %v1099_v33 = vpop.f32.mrf.mxu1 }
 0x3c7   : > { %v1252_v36 = vcombine.low %v1026_v30, %v1028_v32  ;;  %v1253_v39 = vcombine.low %v1097_v1, %v1099_v33 }
 0x3c9   : > { %v1260_v40 = vrot.slane %v1252_v36, %v1259_v31  ;;  %v1267_v41 = vrot.slane %v1253_v39, %v1259_v31 }
 0x3cb   : > { %v1268_v42 = vcombine.low %v1260_v40, %v1267_v41 }
 0x3cd   : > { %1288 = vst [vmem:[%s282_s27] sm:$0xff] %v1268_v42 }
 0x405   : > { %v1168_v20 = vpop.f32.mrf.mxu0  ;;  %v1239_v37 = vpop.f32.mrf.mxu1 }
 0x407   : > { %v1170_v38 = vpop.f32.mrf.mxu0  ;;  %v1241_v5 = vpop.f32.mrf.mxu1 }
 0x408   : > { %v1269_v44 = vcombine.low %v1168_v20, %v1170_v38  ;;  %v1270_v24 = vcombine.low %v1239_v37, %v1241_v5 }
 0x40a   : > { %v1277_v46 = vrot.slane %v1269_v44, %v1259_v31  ;;  %v1284_v47 = vrot.slane %v1270_v24, %v1259_v31 }
 0x40c   : > { %v1285_v48 = vcombine.low %v1277_v46, %v1284_v47 }
 0x40e   : > { %1289 = vst [vmem:[%s282_s27 + $0x8] sm:$0xff] %v1285_v48 }
 0x40f   : > { %1559 = shalt.err (!%p1556_p0)
}
 0x410   : > { %s1560_s7 = scalar_lea.hbm %s1303_s30, 256  ;;  %s1564_s5 = scalar_lea.hbm %s2325_s6, 512 }
 0x411   : > { %p1561_p5 = scmp.ne.s32.totalorder %s1303_s30, %s1560_s7  ;;  %p1565_p1 = scmp.lt.s32.totalorder %s1303_s30, %s2325_s6 }
 0x412   : > { %p1566_p4 = scmp.lt.s32.totalorder %s1564_s5, %s1560_s7 }
 0x413   : > { %p1562_p9 = pnand %p1561_p5, %p2416_p3 }
 0x414   : > { %p1567_p6 = por %p1566_p4, %p1565_p1 }
 0x415   : > { %p1563_p12 = pneg %p1562_p9 }
 0x417   : > { %p1568_p8 = pnand %p1567_p6, %p1563_p12 }
 0x419   : > { %1571 = shalt.err (!%p1568_p8)
}
 0x41a   : > { %1427 = dma.vmem_to_hbm [thread:$0]  (%p2416_p3), %s1306_s11, 256, %s1303_s30, %s1291_s15  }
 0x41b PF: > { %s1317_s27 = sand.u32 1, %s1602_s21   ;;  %p2417_p11 = scmp.ne.s32.totalorder %s2340_s28, 0 }
 0x41c   : > { %p2418_p7 = scmp.ge.s32.totalorder %s1614_s24, 2  ;;  %s1318_s10 = scalar_lea.sflag [#allocation4], %s1317_s27 }
 0x41e   : > { %p1438_p10 = pnand %p2418_p7, %p2417_p11 }
 0x420   : > { %p1439_p2 = pneg %p1438_p10 }
 0x422   : > { %1597 = dma.done.wait (%p1439_p2), %s1318_s10, 256  }
 0x423   : > { %1599 = vsyncadd (%p1439_p2), %s1318_s10, 4294967040  ;;  %p20_p13 = scmp.ge.s32.totalorder %s1721_s9, 4   ;;  %s2419_s21 = smov %s1606_s22 }
 0x424   : > { %s2420_s22 = smov %s1610_s23  ;;  %s2421_s23 = smov %s1738_s17 }
 0x425   : > { %s2422_s24 = smov %s1721_s9  ;;  %22 = sbr.rel (!%p20_p13) target bundleno = 8 (0x8), region = 93 }
 0x42a   :  { %1323 = vsyncpa [#allocation3], 1 }
 0x42b   :  { %1325 = vsyncpa [#allocation3 + $0x1], 1 }
 0x42c   :  { %1326 = vsyncpa [#allocation6], 1 }
 0x42d   :  { %1327 = vsyncpa [#allocation4], 1 }
 0x42e   :  { %1329 = vsyncpa [#allocation4 + $0x1], 1 }

</bundles_post_ra>
